<compile_context>
chip_gen: v7x
topology: tpu7x:2x2x1
jax: 0.10.0
libtpu: 0.0.40
codegen_flags: <defaults>
</compile_context>

<pallas_src>
import functools

import jax
import jax.numpy as jnp
from jax.experimental import pallas as pl
from jax.experimental.pallas import tpu as pltpu


def _layernorm(x, gamma, beta, eps=1e-5):
    mean = jnp.mean(x, axis=-1, keepdims=True)
    xc = x - mean
    var = jnp.mean(xc * xc, axis=-1, keepdims=True)
    return xc * jax.lax.rsqrt(var + eps) * gamma + beta


def transformer_kernel(
    x_ref, bias_ref, vec_ref,
    wqkv_ref, wo_ref, w1_ref, b1_ref, w2_ref,
    out_ref,
    *, heads, dim_head, scale):
    """Grid = (batch_block, layer).  out_ref is resident across the layer axis and
    carries the residual stream for the current group of block_b sequences.

    vec_ref rows (per layer): 0 ln1_gamma, 1 ln1_beta, 2 ln2_gamma, 3 ln2_beta,
                              4 attn out-proj bias, 5 ffn second bias, 6-7 padding.
    """
    layer = pl.program_id(1)

    # First layer for this batch block: seed the residual stream from the input.
    @pl.when(layer == 0)
    def _():
        out_ref[...] = x_ref[...]

    Bt, N, D = out_ref.shape
    inner = heads * dim_head
    M = Bt * N

    x = out_ref[...].reshape(M, D)            # (M, D) f32 residual stream
    vecs = vec_ref[0]                         # (8, D) packed per-layer vectors
    ln1_g, ln1_b = vecs[0:1], vecs[1:2]
    ln2_g, ln2_b = vecs[2:3], vecs[3:4]
    bo, b2 = vecs[4:5], vecs[5:6]

    # ---------------- PreNorm + multi-head self-attention ----------------
    xn = _layernorm(x, ln1_g, ln1_b).astype(jnp.bfloat16)

    # Fully fused QKV: one wide (M, D) x (D, 3*inner) bf16 matmul, f32 accumulation.
    qkv = jnp.dot(xn, wqkv_ref[0], preferred_element_type=jnp.float32)   # (M, 3*inner)
    q = qkv[:, :inner] * scale                # fold softmax scale into q (cheap)
    k = qkv[:, inner:2 * inner]
    v = qkv[:, 2 * inner:]

    def to_heads(t):
        # (M, H*dh) -> (Bt*H, N, dh): single reshape + transpose (no per-head lane
        # slicing); dh is a multiple of 128 in the demo so head slices are whole
        # lane blocks.
        t = t.reshape(Bt, N, heads, dim_head).transpose(0, 2, 1, 3)
        return t.reshape(Bt * heads, N, dim_head).astype(jnp.bfloat16)

    q3 = to_heads(q)                          # (G, N, dh), G = Bt*heads
    k3 = to_heads(k)
    v3 = to_heads(v)

    # Batched-over-(sequence, head) QK^T, softmax (f32 stats), attn @ V.
    # TODO(synk): replace with flash-style KV tiling (online softmax) for large N.
    dots = jnp.einsum('gqd,gkd->gqk', q3, k3,
                      preferred_element_type=jnp.float32)                # (G, N, N)
    bias = jnp.broadcast_to(bias_ref[...][:, None],
                            (Bt, heads, 1, N)).reshape(Bt * heads, 1, N)
    dots = dots + bias
    m = jnp.max(dots, axis=-1, keepdims=True)
    p = jnp.exp(dots - m)
    attn = p * pl.reciprocal(jnp.sum(p, axis=-1, keepdims=True), approx=True)
    o3 = jnp.einsum('gqk,gkd->gqd', attn.astype(jnp.bfloat16), v3,
                    preferred_element_type=jnp.float32)                  # (G, N, dh)

    # Merge heads back onto lanes and run a single (M, inner) x (inner, D) out-proj
    # matmul (full-width contraction, head-sum absorbed into the contraction).
    o = (o3.reshape(Bt, heads, N, dim_head)
           .transpose(0, 2, 1, 3)
           .reshape(M, inner)
           .astype(jnp.bfloat16))
    attn_out = jnp.dot(o, wo_ref[0], preferred_element_type=jnp.float32) + bo

    x1 = x + attn_out                         # residual: x + Attention(LN(x))

    # ---------------- PreNorm + FeedForward ----------------
    xn2 = _layernorm(x1, ln2_g, ln2_b).astype(jnp.bfloat16)
    h1 = jnp.dot(xn2, w1_ref[0], preferred_element_type=jnp.float32) + b1_ref[0]
    # TODO(synk): PyTorch nn.GELU() default is the erf-exact form; tanh approximation
    # is used here (Mosaic/EUP-friendly), ~1e-3 divergence (plus bf16-matmul noise).
    h1 = jax.nn.gelu(h1, approximate=True)
    y = jnp.dot(h1.astype(jnp.bfloat16), w2_ref[0],
                preferred_element_type=jnp.float32) + b2

    out_ref[...] = (x1 + y).reshape(Bt, N, D)   # residual: x1 + FF(LN(x1))


def _default_vmem_limit_bytes():
    # ~75% of physical VMEM: ~96 MiB on v5e/v6e (128 MiB), ~48 MiB on v7x (64 MiB).
    try:
        cap = pltpu.get_tpu_info().vmem_capacity_bytes
    except Exception:
        cap = 64 * 1024 * 1024
    return int(cap * 3) // 4


def transformer_forward(x, params, src_key_padding_mask=None, *,
                        heads, dim_head, block_b=None, vmem_limit_bytes=None):
    B, N, D = x.shape
    depth = params["wqkv"].shape[0]
    inner = heads * dim_head
    assert params["wqkv"].shape[1:] == (D, 3 * inner)
    mlp_dim = params["w1"].shape[2]
    scale = dim_head ** -0.5

    if block_b is None:
        # Amortize per-layer weight streaming over several sequences while keeping
        # >=2 blocks on the parallel batch axis (v7x megacore) when possible.
        block_b = B // 2 if (B >= 2 and B % 2 == 0) else B
    assert B % block_b == 0

    if vmem_limit_bytes is None:
        vmem_limit_bytes = _default_vmem_limit_bytes()

    if src_key_padding_mask is None:
        bias = jnp.zeros((B, 1, N), jnp.float32)
    else:
        # Large finite negative instead of -inf (avoids NaN from -inf arithmetic).
        bias = jnp.where(src_key_padding_mask.reshape(B, 1, N), -1e30, 0.0
                         ).astype(jnp.float32)

    kernel = functools.partial(transformer_kernel,
                               heads=heads, dim_head=dim_head, scale=scale)

    def per_layer(shape):
        n = len(shape)
        return pl.BlockSpec((1,) + tuple(shape),
                            lambda b, l, n=n: (l,) + (0,) * n)

    in_specs = [
        pl.BlockSpec((block_b, N, D), lambda b, l: (b, 0, 0)),   # x
        pl.BlockSpec((block_b, 1, N), lambda b, l: (b, 0, 0)),   # key-padding bias
        per_layer((8, D)),                                        # packed ln/bias vectors
        per_layer((D, 3 * inner)),                                # wqkv (fused heads+qkv)
        per_layer((inner, D)),                                    # wo (heads merged)
        per_layer((D, mlp_dim)), per_layer((1, mlp_dim)),         # w1, b1
        per_layer((mlp_dim, D)),                                  # w2
    ]

    return pl.pallas_call(
        kernel,
        out_shape=jax.ShapeDtypeStruct((B, N, D), jnp.float32),
        grid=(B // block_b, depth),
        in_specs=in_specs,
        out_specs=pl.BlockSpec((block_b, N, D), lambda b, l: (b, 0, 0)),
        compiler_params=pltpu.CompilerParams(
            dimension_semantics=("parallel", "arbitrary"),
            vmem_limit_bytes=vmem_limit_bytes),
    )(x, bias,
      params["vecs"],
      params["wqkv"], params["wo"],
      params["w1"], params["b1"], params["w2"])


def init_params(key, dim, depth, heads, dim_head, mlp_dim):
    """Per-layer weights stacked on a leading depth axis; matmul weights in bf16.

    Layout vs PyTorch:
      wqkv = concat([Wq.T, Wk.T, Wv.T], axis=-1)           (dim, 3*heads*dim_head)
      wo   = to_out Linear weight.T                        (heads*dim_head, dim)
             rows = heads concatenated along the input dim (b n (h d) ordering).
      vecs rows: 0 ln1_gamma, 1 ln1_beta, 2 ln2_gamma, 3 ln2_beta, 4 attn bias,
                 5 ffn-out bias, 6-7 padding.
    """
    inner = heads * dim_head
    ks = jax.random.split(key, 4)

    def w(k, shape):
        return (jax.random.normal(k, (depth,) + shape, jnp.float32) * 0.05
                ).astype(jnp.bfloat16)

    vecs = jnp.zeros((depth, 8, dim), jnp.float32)
    vecs = vecs.at[:, 0].set(1.0)    # ln1 gamma
    vecs = vecs.at[:, 2].set(1.0)    # ln2 gamma

    return dict(
        vecs=vecs,
        wqkv=w(ks[0], (dim, 3 * inner)),
        wo=w(ks[1], (inner, dim)),
        w1=w(ks[2], (dim, mlp_dim)),
        b1=jnp.zeros((depth, 1, mlp_dim), jnp.float32),
        w2=w(ks[3], (mlp_dim, dim)),
    )


if __name__ == "__main__":
    # Small but lane-dense demo config (D and dim_head are multiples of 128 per the
    # perf review; B//block_b = 2 parallel grid blocks for megacore).
    B, N = 4, 8
    dim, depth, heads, dim_head, mlp_dim = 128, 2, 2, 128, 256

    key = jax.random.PRNGKey(0)
    x = jax.random.normal(jax.random.fold_in(key, 123), (B, N, dim), jnp.float32)
    params = init_params(key, dim, depth, heads, dim_head, mlp_dim)

    out = transformer_forward(x, params, None, heads=heads, dim_head=dim_head,
                              block_b=2)
    jax.block_until_ready(out)
    assert out.shape == (B, N, dim) and out.dtype == jnp.float32
    assert bool(jnp.all(jnp.isfinite(out)))
    print("KERNEL_OK")
</pallas_src>

<mosaic_0001>
module attributes {stable_mosaic.version = 11 : i64} {
  func.func @transformer_kernel(%arg0: i32, %arg1: i32, %arg2: memref<2x8x128xf32, #tpu.memory_space<vmem>>, %arg3: memref<2x1x8xf32, #tpu.memory_space<vmem>>, %arg4: memref<1x8x128xf32, #tpu.memory_space<vmem>>, %arg5: memref<1x128x768xbf16, #tpu.memory_space<vmem>>, %arg6: memref<1x256x128xbf16, #tpu.memory_space<vmem>>, %arg7: memref<1x128x256xbf16, #tpu.memory_space<vmem>>, %arg8: memref<1x1x256xf32, #tpu.memory_space<vmem>>, %arg9: memref<1x256x128xbf16, #tpu.memory_space<vmem>>, %arg10: memref<2x8x128xf32, #tpu.memory_space<vmem>>) attributes {dimension_semantics = [#tpu.dimension_semantics<parallel>, #tpu.dimension_semantics<arbitrary>], iteration_bounds = array<i64: 2, 2>, scalar_prefetch = 0 : i64, scratch_operands = 0 : i64, tpu.core_type = #tpu.core_type<tc>, window_params = [{transform_indices = @transform_0, window_bounds = array<i64: 2, 8, 128>}, {transform_indices = @transform_1, window_bounds = array<i64: 2, 1, 8>}, {transform_indices = @transform_2, window_bounds = array<i64: 1, 8, 128>}, {transform_indices = @transform_3, window_bounds = array<i64: 1, 128, 768>}, {transform_indices = @transform_4, window_bounds = array<i64: 1, 256, 128>}, {transform_indices = @transform_5, window_bounds = array<i64: 1, 128, 256>}, {transform_indices = @transform_6, window_bounds = array<i64: 1, 1, 256>}, {transform_indices = @transform_7, window_bounds = array<i64: 1, 256, 128>}, {transform_indices = @transform_8, window_bounds = array<i64: 2, 8, 128>}]} {
    %c0_i32 = arith.constant 0 : i32
    %0 = arith.cmpi eq, %arg1, %c0_i32 : i32
    %1 = arith.extui %0 : i1 to i32
    %c0_i32_0 = arith.constant 0 : i32
    %2 = arith.cmpi ne, %1, %c0_i32_0 : i32
    scf.if %2 {
      %c0_49 = arith.constant 0 : index
      %c0_50 = arith.constant 0 : index
      %c0_51 = arith.constant 0 : index
      %134 = vector.load %arg2[%c0_49, %c0_50, %c0_51] : memref<2x8x128xf32, #tpu.memory_space<vmem>>, vector<2x8x128xf32>
      %c0_52 = arith.constant 0 : index
      %c0_53 = arith.constant 0 : index
      %c0_54 = arith.constant 0 : index
      %135 = vector.load %arg10[%c0_52, %c0_53, %c0_54] : memref<2x8x128xf32, #tpu.memory_space<vmem>>, vector<2x8x128xf32>
      tpu.vector_store %arg10[%c0_52, %c0_53, %c0_54], %134 {strides = array<i32>} : memref<2x8x128xf32, #tpu.memory_space<vmem>>, vector<2x8x128xf32>,
    } else {
    }
    %c0 = arith.constant 0 : index
    %c0_1 = arith.constant 0 : index
    %c0_2 = arith.constant 0 : index
    %3 = vector.load %arg10[%c0, %c0_1, %c0_2] : memref<2x8x128xf32, #tpu.memory_space<vmem>>, vector<2x8x128xf32>
    %4 = vector.shape_cast %3 : vector<2x8x128xf32> to vector<16x128xf32>
    %c0_3 = arith.constant 0 : index
    %c0_4 = arith.constant 0 : index
    %c0_5 = arith.constant 0 : index
    %5 = vector.load %arg4[%c0_3, %c0_4, %c0_5] : memref<1x8x128xf32, #tpu.memory_space<vmem>>, vector<1x8x128xf32>
    %6 = vector.shape_cast %5 : vector<1x8x128xf32> to vector<8x128xf32>
    %7 = vector.extract_strided_slice %6 {offsets = [0, 0], sizes = [1, 128], strides = [1, 1]} : vector<8x128xf32> to vector<1x128xf32>
    %8 = vector.extract_strided_slice %6 {offsets = [1, 0], sizes = [1, 128], strides = [1, 1]} : vector<8x128xf32> to vector<1x128xf32>
    %9 = vector.extract_strided_slice %6 {offsets = [2, 0], sizes = [1, 128], strides = [1, 1]} : vector<8x128xf32> to vector<1x128xf32>
    %10 = vector.extract_strided_slice %6 {offsets = [3, 0], sizes = [1, 128], strides = [1, 1]} : vector<8x128xf32> to vector<1x128xf32>
    %11 = vector.extract_strided_slice %6 {offsets = [4, 0], sizes = [1, 128], strides = [1, 1]} : vector<8x128xf32> to vector<1x128xf32>
    %12 = vector.extract_strided_slice %6 {offsets = [5, 0], sizes = [1, 128], strides = [1, 1]} : vector<8x128xf32> to vector<1x128xf32>
    %cst = arith.constant dense<0.000000e+00> : vector<16xf32>
    %13 = vector.multi_reduction <add>, %4, %cst [1] : vector<16x128xf32> to vector<16xf32>
    %14 = vector.shape_cast %13 : vector<16xf32> to vector<16x1xf32>
    %cst_6 = arith.constant 1.280000e+02 : f32
    %15 = vector.broadcast %cst_6 : f32 to vector<16x1xf32>
    %16 = arith.divf %14, %15 : vector<16x1xf32>
    %17 = vector.broadcast %16 : vector<16x1xf32> to vector<16x128xf32>
    %18 = arith.subf %4, %17 : vector<16x128xf32>
    %19 = arith.mulf %18, %18 : vector<16x128xf32>
    %cst_7 = arith.constant dense<0.000000e+00> : vector<16xf32>
    %20 = vector.multi_reduction <add>, %19, %cst_7 [1] : vector<16x128xf32> to vector<16xf32>
    %21 = vector.shape_cast %20 : vector<16xf32> to vector<16x1xf32>
    %cst_8 = arith.constant 1.280000e+02 : f32
    %22 = vector.broadcast %cst_8 : f32 to vector<16x1xf32>
    %23 = arith.divf %21, %22 : vector<16x1xf32>
    %cst_9 = arith.constant 9.99999974E-6 : f32
    %24 = vector.broadcast %cst_9 : f32 to vector<16x1xf32>
    %25 = arith.addf %23, %24 : vector<16x1xf32>
    %26 = math.rsqrt %25 : vector<16x1xf32>
    %27 = vector.broadcast %26 : vector<16x1xf32> to vector<16x128xf32>
    %28 = arith.mulf %18, %27 : vector<16x128xf32>
    %29 = vector.broadcast %7 : vector<1x128xf32> to vector<16x128xf32>
    %30 = arith.mulf %28, %29 : vector<16x128xf32>
    %31 = vector.broadcast %8 : vector<1x128xf32> to vector<16x128xf32>
    %32 = arith.addf %30, %31 : vector<16x128xf32>
    %33 = arith.truncf %32 : vector<16x128xf32> to vector<16x128xbf16>
    %c0_10 = arith.constant 0 : index
    %c0_11 = arith.constant 0 : index
    %c0_12 = arith.constant 0 : index
    %34 = vector.load %arg5[%c0_10, %c0_11, %c0_12] : memref<1x128x768xbf16, #tpu.memory_space<vmem>>, vector<1x128x768xbf16>
    %35 = vector.shape_cast %34 : vector<1x128x768xbf16> to vector<128x768xbf16>
    %cst_13 = arith.constant dense<0.000000e+00> : vector<16x768xf32>
    %36 = tpu.matmul %33, %35, %cst_13 {dimension_numbers = #tpu.dot_dimension_numbers<[1], [0], [0], [1], [0, 0, 1, 1], [], []>} : vector<16x128xbf16>, vector<128x768xbf16>, vector<16x768xf32> -> vector<16x768xf32>
    %37 = vector.extract_strided_slice %36 {offsets = [0, 0], sizes = [16, 256], strides = [1, 1]} : vector<16x768xf32> to vector<16x256xf32>
    %cst_14 = arith.constant 0.0883883461 : f32
    %38 = vector.broadcast %cst_14 : f32 to vector<16x256xf32>
    %39 = arith.mulf %37, %38 : vector<16x256xf32>
    %40 = vector.extract_strided_slice %36 {offsets = [0, 256], sizes = [16, 256], strides = [1, 1]} : vector<16x768xf32> to vector<16x256xf32>
    %41 = vector.extract_strided_slice %36 {offsets = [0, 512], sizes = [16, 256], strides = [1, 1]} : vector<16x768xf32> to vector<16x256xf32>
    %42 = vector.shape_cast %39 : vector<16x256xf32> to vector<2x8x2x128xf32>
    %43 = tpu.transpose %42, [0, 2, 1, 3] : vector<2x8x2x128xf32> -> vector<2x2x8x128xf32>
    %44 = vector.shape_cast %43 : vector<2x2x8x128xf32> to vector<4x8x128xf32>
    %45 = arith.truncf %44 : vector<4x8x128xf32> to vector<4x8x128xbf16>
    %46 = vector.shape_cast %40 : vector<16x256xf32> to vector<2x8x2x128xf32>
    %47 = tpu.transpose %46, [0, 2, 1, 3] : vector<2x8x2x128xf32> -> vector<2x2x8x128xf32>
    %48 = vector.shape_cast %47 : vector<2x2x8x128xf32> to vector<4x8x128xf32>
    %49 = arith.truncf %48 : vector<4x8x128xf32> to vector<4x8x128xbf16>
    %50 = vector.shape_cast %41 : vector<16x256xf32> to vector<2x8x2x128xf32>
    %51 = tpu.transpose %50, [0, 2, 1, 3] : vector<2x8x2x128xf32> -> vector<2x2x8x128xf32>
    %52 = vector.shape_cast %51 : vector<2x2x8x128xf32> to vector<4x8x128xf32>
    %53 = arith.truncf %52 : vector<4x8x128xf32> to vector<4x8x128xbf16>
    "tpu.trace_start"() <{level = 10 : i32, message = "gqd,gkd->gqk"}> : () -> ()
    %cst_15 = arith.constant dense<0.000000e+00> : vector<4x8x8xf32>
    %54 = tpu.matmul %45, %49, %cst_15 {dimension_numbers = #tpu.dot_dimension_numbers<[2], [2], [1], [1], [0, 0, 0, 1, 1, 1], [0], [0]>} : vector<4x8x128xbf16>, vector<4x8x128xbf16>, vector<4x8x8xf32> -> vector<4x8x8xf32>
    "tpu.trace_stop"() : () -> ()
    %c0_16 = arith.constant 0 : index
    %c0_17 = arith.constant 0 : index
    %c0_18 = arith.constant 0 : index
    %55 = vector.load %arg3[%c0_16, %c0_17, %c0_18] : memref<2x1x8xf32, #tpu.memory_space<vmem>>, vector<2x1x8xf32>
    %56 = vector.shape_cast %55 : vector<2x1x8xf32> to vector<2x1x1x8xf32>
    %57 = vector.shape_cast %56 : vector<2x1x1x8xf32> to vector<2x1x1x8xf32>
    %58 = vector.broadcast %57 : vector<2x1x1x8xf32> to vector<2x2x1x8xf32>
    %59 = vector.shape_cast %58 : vector<2x2x1x8xf32> to vector<4x1x8xf32>
    %60 = vector.broadcast %59 : vector<4x1x8xf32> to vector<4x8x8xf32>
    %61 = arith.addf %54, %60 : vector<4x8x8xf32>
    %cst_19 = arith.constant dense<0xFF800000> : vector<4x8xf32>
    %62 = vector.multi_reduction <maximumf>, %61, %cst_19 [2] : vector<4x8x8xf32> to vector<4x8xf32>
    %63 = vector.shape_cast %62 : vector<4x8xf32> to vector<4x8x1xf32>
    %64 = vector.broadcast %63 : vector<4x8x1xf32> to vector<4x8x8xf32>
    %65 = arith.subf %61, %64 : vector<4x8x8xf32>
    %66 = math.exp %65 : vector<4x8x8xf32>
    %cst_20 = arith.constant dense<0.000000e+00> : vector<4x8xf32>
    %67 = vector.multi_reduction <add>, %66, %cst_20 [2] : vector<4x8x8xf32> to vector<4x8xf32>
    %68 = vector.shape_cast %67 : vector<4x8xf32> to vector<4x8x1xf32>
    %69 = tpu.reciprocal %68 {approx = true} : vector<4x8x1xf32> -> vector<4x8x1xf32>
    %70 = vector.broadcast %69 : vector<4x8x1xf32> to vector<4x8x8xf32>
    %71 = arith.mulf %66, %70 : vector<4x8x8xf32>
    %72 = arith.truncf %71 : vector<4x8x8xf32> to vector<4x8x8xbf16>
    "tpu.trace_start"() <{level = 10 : i32, message = "gqk,gkd->gqd"}> : () -> ()
    %cst_21 = arith.constant dense<0.000000e+00> : vector<4x8x128xf32>
    %73 = tpu.matmul %72, %53, %cst_21 {dimension_numbers = #tpu.dot_dimension_numbers<[2], [1], [1], [2], [0, 0, 0, 1, 1, 2], [0], [0]>} : vector<4x8x8xbf16>, vector<4x8x128xbf16>, vector<4x8x128xf32> -> vector<4x8x128xf32>
    "tpu.trace_stop"() : () -> ()
    %74 = vector.shape_cast %73 : vector<4x8x128xf32> to vector<2x2x8x128xf32>
    %75 = tpu.transpose %74, [0, 2, 1, 3] : vector<2x2x8x128xf32> -> vector<2x8x2x128xf32>
    %76 = vector.shape_cast %75 : vector<2x8x2x128xf32> to vector<16x256xf32>
    %77 = arith.truncf %76 : vector<16x256xf32> to vector<16x256xbf16>
    %c0_22 = arith.constant 0 : index
    %c0_23 = arith.constant 0 : index
    %c0_24 = arith.constant 0 : index
    %78 = vector.load %arg6[%c0_22, %c0_23, %c0_24] : memref<1x256x128xbf16, #tpu.memory_space<vmem>>, vector<1x256x128xbf16>
    %79 = vector.shape_cast %78 : vector<1x256x128xbf16> to vector<256x128xbf16>
    %cst_25 = arith.constant dense<0.000000e+00> : vector<16x128xf32>
    %80 = tpu.matmul %77, %79, %cst_25 {dimension_numbers = #tpu.dot_dimension_numbers<[1], [0], [0], [1], [0, 0, 1, 1], [], []>} : vector<16x256xbf16>, vector<256x128xbf16>, vector<16x128xf32> -> vector<16x128xf32>
    %81 = vector.broadcast %11 : vector<1x128xf32> to vector<16x128xf32>
    %82 = arith.addf %80, %81 : vector<16x128xf32>
    %83 = arith.addf %4, %82 : vector<16x128xf32>
    %cst_26 = arith.constant dense<0.000000e+00> : vector<16xf32>
    %84 = vector.multi_reduction <add>, %83, %cst_26 [1] : vector<16x128xf32> to vector<16xf32>
    %85 = vector.shape_cast %84 : vector<16xf32> to vector<16x1xf32>
    %cst_27 = arith.constant 1.280000e+02 : f32
    %86 = vector.broadcast %cst_27 : f32 to vector<16x1xf32>
    %87 = arith.divf %85, %86 : vector<16x1xf32>
    %88 = vector.broadcast %87 : vector<16x1xf32> to vector<16x128xf32>
    %89 = arith.subf %83, %88 : vector<16x128xf32>
    %90 = arith.mulf %89, %89 : vector<16x128xf32>
    %cst_28 = arith.constant dense<0.000000e+00> : vector<16xf32>
    %91 = vector.multi_reduction <add>, %90, %cst_28 [1] : vector<16x128xf32> to vector<16xf32>
    %92 = vector.shape_cast %91 : vector<16xf32> to vector<16x1xf32>
    %cst_29 = arith.constant 1.280000e+02 : f32
    %93 = vector.broadcast %cst_29 : f32 to vector<16x1xf32>
    %94 = arith.divf %92, %93 : vector<16x1xf32>
    %cst_30 = arith.constant 9.99999974E-6 : f32
    %95 = vector.broadcast %cst_30 : f32 to vector<16x1xf32>
    %96 = arith.addf %94, %95 : vector<16x1xf32>
    %97 = math.rsqrt %96 : vector<16x1xf32>
    %98 = vector.broadcast %97 : vector<16x1xf32> to vector<16x128xf32>
    %99 = arith.mulf %89, %98 : vector<16x128xf32>
    %100 = vector.broadcast %9 : vector<1x128xf32> to vector<16x128xf32>
    %101 = arith.mulf %99, %100 : vector<16x128xf32>
    %102 = vector.broadcast %10 : vector<1x128xf32> to vector<16x128xf32>
    %103 = arith.addf %101, %102 : vector<16x128xf32>
    %104 = arith.truncf %103 : vector<16x128xf32> to vector<16x128xbf16>
    %c0_31 = arith.constant 0 : index
    %c0_32 = arith.constant 0 : index
    %c0_33 = arith.constant 0 : index
    %105 = vector.load %arg7[%c0_31, %c0_32, %c0_33] : memref<1x128x256xbf16, #tpu.memory_space<vmem>>, vector<1x128x256xbf16>
    %106 = vector.shape_cast %105 : vector<1x128x256xbf16> to vector<128x256xbf16>
    %cst_34 = arith.constant dense<0.000000e+00> : vector<16x256xf32>
    %107 = tpu.matmul %104, %106, %cst_34 {dimension_numbers = #tpu.dot_dimension_numbers<[1], [0], [0], [1], [0, 0, 1, 1], [], []>} : vector<16x128xbf16>, vector<128x256xbf16>, vector<16x256xf32> -> vector<16x256xf32>
    %c0_35 = arith.constant 0 : index
    %c0_36 = arith.constant 0 : index
    %c0_37 = arith.constant 0 : index
    %108 = vector.load %arg8[%c0_35, %c0_36, %c0_37] : memref<1x1x256xf32, #tpu.memory_space<vmem>>, vector<1x1x256xf32>
    %109 = vector.shape_cast %108 : vector<1x1x256xf32> to vector<1x256xf32>
    %110 = vector.broadcast %109 : vector<1x256xf32> to vector<16x256xf32>
    %111 = arith.addf %107, %110 : vector<16x256xf32>
    %112 = arith.mulf %111, %111 : vector<16x256xf32>
    %113 = arith.mulf %111, %112 : vector<16x256xf32>
    %cst_38 = arith.constant 4.471500e-02 : f32
    %114 = vector.broadcast %cst_38 : f32 to vector<16x256xf32>
    %115 = arith.mulf %114, %113 : vector<16x256xf32>
    %116 = arith.addf %111, %115 : vector<16x256xf32>
    %cst_39 = arith.constant 0.797884583 : f32
    %117 = vector.broadcast %cst_39 : f32 to vector<16x256xf32>
    %118 = arith.mulf %117, %116 : vector<16x256xf32>
    %119 = math.tanh %118 : vector<16x256xf32>
    %cst_40 = arith.constant 1.000000e+00 : f32
    %120 = vector.broadcast %cst_40 : f32 to vector<16x256xf32>
    %121 = arith.addf %120, %119 : vector<16x256xf32>
    %cst_41 = arith.constant 5.000000e-01 : f32
    %122 = vector.broadcast %cst_41 : f32 to vector<16x256xf32>
    %123 = arith.mulf %122, %121 : vector<16x256xf32>
    %124 = arith.mulf %111, %123 : vector<16x256xf32>
    %125 = arith.truncf %124 : vector<16x256xf32> to vector<16x256xbf16>
    %c0_42 = arith.constant 0 : index
    %c0_43 = arith.constant 0 : index
    %c0_44 = arith.constant 0 : index
    %126 = vector.load %arg9[%c0_42, %c0_43, %c0_44] : memref<1x256x128xbf16, #tpu.memory_space<vmem>>, vector<1x256x128xbf16>
    %127 = vector.shape_cast %126 : vector<1x256x128xbf16> to vector<256x128xbf16>
    %cst_45 = arith.constant dense<0.000000e+00> : vector<16x128xf32>
    %128 = tpu.matmul %125, %127, %cst_45 {dimension_numbers = #tpu.dot_dimension_numbers<[1], [0], [0], [1], [0, 0, 1, 1], [], []>} : vector<16x256xbf16>, vector<256x128xbf16>, vector<16x128xf32> -> vector<16x128xf32>
    %129 = vector.broadcast %12 : vector<1x128xf32> to vector<16x128xf32>
    %130 = arith.addf %128, %129 : vector<16x128xf32>
    %131 = arith.addf %83, %130 : vector<16x128xf32>
    %132 = vector.shape_cast %131 : vector<16x128xf32> to vector<2x8x128xf32>
    %c0_46 = arith.constant 0 : index
    %c0_47 = arith.constant 0 : index
    %c0_48 = arith.constant 0 : index
    %133 = vector.load %arg10[%c0_46, %c0_47, %c0_48] : memref<2x8x128xf32, #tpu.memory_space<vmem>>, vector<2x8x128xf32>
    tpu.vector_store %arg10[%c0_46, %c0_47, %c0_48], %132 {strides = array<i32>} : memref<2x8x128xf32, #tpu.memory_space<vmem>>, vector<2x8x128xf32>,
    return
  }
  func.func @transform_0(%arg0: i32, %arg1: i32) -> (i32, i32, i32) {
    %c0_i32 = arith.constant 0 : i32
    %c0_i32_0 = arith.constant 0 : i32
    %c0_i32_1 = arith.constant 0 : i32
    return %arg0, %c0_i32, %c0_i32_0 : i32, i32, i32
  }
  func.func @transform_1(%arg0: i32, %arg1: i32) -> (i32, i32, i32) {
    %c0_i32 = arith.constant 0 : i32
    %c0_i32_0 = arith.constant 0 : i32
    %c0_i32_1 = arith.constant 0 : i32
    return %arg0, %c0_i32, %c0_i32_0 : i32, i32, i32
  }
  func.func @transform_2(%arg0: i32, %arg1: i32) -> (i32, i32, i32) {
    %c0_i32 = arith.constant 0 : i32
    %c0_i32_0 = arith.constant 0 : i32
    %c0_i32_1 = arith.constant 0 : i32
    return %arg1, %c0_i32, %c0_i32_0 : i32, i32, i32
  }
  func.func @transform_3(%arg0: i32, %arg1: i32) -> (i32, i32, i32) {
    %c0_i32 = arith.constant 0 : i32
    %c0_i32_0 = arith.constant 0 : i32
    %c0_i32_1 = arith.constant 0 : i32
    return %arg1, %c0_i32, %c0_i32_0 : i32, i32, i32
  }
  func.func @transform_4(%arg0: i32, %arg1: i32) -> (i32, i32, i32) {
    %c0_i32 = arith.constant 0 : i32
    %c0_i32_0 = arith.constant 0 : i32
    %c0_i32_1 = arith.constant 0 : i32
    return %arg1, %c0_i32, %c0_i32_0 : i32, i32, i32
  }
  func.func @transform_5(%arg0: i32, %arg1: i32) -> (i32, i32, i32) {
    %c0_i32 = arith.constant 0 : i32
    %c0_i32_0 = arith.constant 0 : i32
    %c0_i32_1 = arith.constant 0 : i32
    return %arg1, %c0_i32, %c0_i32_0 : i32, i32, i32
  }
  func.func @transform_6(%arg0: i32, %arg1: i32) -> (i32, i32, i32) {
    %c0_i32 = arith.constant 0 : i32
    %c0_i32_0 = arith.constant 0 : i32
    %c0_i32_1 = arith.constant 0 : i32
    return %arg1, %c0_i32, %c0_i32_0 : i32, i32, i32
  }
  func.func @transform_7(%arg0: i32, %arg1: i32) -> (i32, i32, i32) {
    %c0_i32 = arith.constant 0 : i32
    %c0_i32_0 = arith.constant 0 : i32
    %c0_i32_1 = arith.constant 0 : i32
    return %arg1, %c0_i32, %c0_i32_0 : i32, i32, i32
  }
  func.func @transform_8(%arg0: i32, %arg1: i32) -> (i32, i32, i32) {
    %c0_i32 = arith.constant 0 : i32
    %c0_i32_0 = arith.constant 0 : i32
    %c0_i32_1 = arith.constant 0 : i32
    return %arg0, %c0_i32, %c0_i32_0 : i32, i32, i32
  }
}

</mosaic_0001>

<bundles_post_ra>
// kernel: tpu_custom_call.1
= control target key start
LH: loop header
LB: loop body
LE: loop exit
PB: predicated region body
PF: predicated region fallthrough
CT: control target
= control target key end

     0   :  { %s5100_s0 = inlined_call_operand.hbm [shape: f32[4,8,128], index: 0, kind: input, shape index: {}]   ;;  %s5101_s1 = inlined_call_operand.hbm [shape: f32[4,1,8], index: 1, kind: input, shape index: {}]   ;;  %s5102_s2 = inlined_call_operand.hbm [shape: f32[2,8,128], index: 2, kind: input, shape index: {}]   ;;  %s5103_s3 = inlined_call_operand.hbm [shape: bf16[2,128,768], index: 3, kind: input, shape index: {}]   ;;  %s5104_s4 = inlined_call_operand.hbm [shape: bf16[2,256,128], index: 4, kind: input, shape index: {}]   ;;  %s5105_s5 = inlined_call_operand.hbm [shape: bf16[2,128,256], index: 5, kind: input, shape index: {}]   ;;  %s5106_s6 = inlined_call_operand.vmem [shape: f32[2,1,256], index: 6, kind: input, shape index: {}]   ;;  %s5107_s7 = inlined_call_operand.hbm [shape: bf16[2,256,128], index: 7, kind: input, shape index: {}]   ;;  %s5108_s8 = inlined_call_operand.hbm [shape: f32[4,8,128], index: 8, kind: output, shape index: {}]  }
   0x1   :  { %5140 = sst [smem:[#allocation37_spill]] %s5101_s1 }
   0x2   :  { %5141 = sst [smem:[#allocation38_spill]] %s5103_s3 }
   0x3   :  { %5142 = sst [smem:[#allocation39_spill]] %s5105_s5 }
   0x4   :  { %5143 = sst [smem:[#allocation40_spill]] %s5106_s6 }
   0x5   :  { %5144 = sst [smem:[#allocation41_spill]] %s5108_s8 }
   0x6   :  { %13 = vsyncpa [#allocation3], 0 }
   0x7   :  { %15 = vsyncpa [#allocation3 + $0x1], 0 }
   0x8   :  { %16 = vsyncpa [#allocation6], 0 }
   0x9   :  { %18 = vsyncpa [#allocation6 + $0x1], 0 }
   0xa   :  { %19 = vsyncpa [#allocation9], 0 }
   0xb   :  { %21 = vsyncpa [#allocation9 + $0x1], 0 }
   0xc   :  { %22 = vsyncpa [#allocation12], 0 }
   0xd   :  { %24 = vsyncpa [#allocation12 + $0x1], 0 }
   0xe   :  { %25 = vsyncpa [#allocation4], 0 }
   0xf   :  { %27 = vsyncpa [#allocation4 + $0x1], 0  ;;  %s4218_s27 = smov 0   ;;  %s4220_s28 = smov 0  }
  0x10   :  { %s4222_s29 = smov 0   ;;  %s4224_s30 = smov 0  }
  0x11   :  { %s4226_s9 = smov 0   ;;  %s4228_s10 = smov 0  }
  0x12   :  { %s4230_s11 = smov 0   ;;  %s4232_s12 = smov 0  }
  0x13   :  { %s4234_s13 = smov 0   ;;  %s4236_s14 = smov 0  }
  0x14   :  { %s4238_s15 = smov 0  }
  0x15 LB: > { %5145 = sst [smem:[#allocation21_spill]] %s4112_s28  ;;  %s4274_s16 = sadd.s32 4294967295, %s4148_s15   ;;  %s4148_s15 = sphi %s4238_s15, %s33_s15   ;;  %s4144_s14 = sphi %s4236_s14, %s5215_s14   ;;  %s4140_s13 = sphi %s4234_s13, %s5214_s13   ;;  %s4136_s12 = sphi %s4232_s12, %s5213_s12   ;;  %s4132_s11 = sphi %s4230_s11, %s5212_s11   ;;  %s4128_s10 = sphi %s4228_s10, %s5207_s10   ;;  %s4124_s9 = sphi %s4226_s9, %s5211_s9   ;;  %s4120_s30 = sphi %s4224_s30, %s5210_s30   ;;  %s4116_s29 = sphi %s4222_s29, %s5205_s29   ;;  %s4112_s28 = sphi %s4220_s28, %s5204_s28   ;;  %s4108_s27 = sphi %s4218_s27, %s5203_s27  }
  0x16   : > { %5146 = sst [smem:[#allocation22_spill]] %s4116_s29  ;;  %s3219_s17 = sadd.s32 4294967294, %s4148_s15  }
  0x17   : > { %5147 = sst [smem:[#allocation23_spill]] %s4120_s30  ;;  %p59_p0 = scmp.ne.s32.totalorder %s4128_s10, %s4124_s9 }
  0x18   : > { %5148 = sst [smem:[#allocation24_spill]] %s4128_s10  ;;  %p5117_p1 = scmp.eq.s32.totalorder %s4148_s15, 0 }
  0x19   : > { %5149 = sst [smem:[#allocation25_spill]] %s4132_s11  ;;  %p65_p2 = scmp.ne.s32.totalorder %s4124_s9, %s4120_s30 }
  0x1a   : > { %5150 = sst [smem:[#allocation26_spill]] %s4136_s12  ;;  %p5116_p3 = scmp.eq.s32.totalorder %s4274_s16, 0 }
  0x1b   : > { %5151 = sst [smem:[#allocation27_spill]] %s4148_s15  ;;  %p61_p4 = por %p5117_p1, %p59_p0 }
  0x1c   : > { %5152 = sst [smem:[#allocation28_spill]] %s4274_s16  ;;  %p271_p5 = scmp.eq.s32.totalorder %s4274_s16, 3 }
  0x1d   : > { %p4290_p6 = por %p5116_p3, %p65_p2  ;;  %p277_p7 = scmp.eq.s32.totalorder %s3219_s17, 3 }
  0x1e   : > { %p4294_p8 = por %p271_p5, %p59_p0  ;;  %p5115_p10 = scmp.lt.s32.totalorder %s4148_s15, 4 }
  0x1f   : > { %s5153_s20 = scalar_select %p4290_p6, 1, 0 }
  0x20   : > { %s5155_s21 = scalar_select %p4294_p8, 1, 0 }
  0x21   : > { %5154 = sst [smem:[#allocation29_spill]] %s5153_s20  ;;  %p4298_p9 = por %p277_p7, %p65_p2 }
  0x22   : > { %5156 = sst [smem:[#allocation30_spill]] %s5155_s21  ;;  %s4304_s23 = sand.u32 1, %s4128_s10  }
  0x23   : > { %s5157_s22 = scalar_select %p4298_p9, 1, 0 }
  0x24   : > { %s4307_s24 = sand.u32 1, %s4148_s15   ;;  %p4311_p11 = pnand %p5115_p10, %p61_p4 }
  0x25   : > { %5158 = sst [smem:[#allocation31_spill]] %s5157_s22  ;;  %s3225_s26 = sshll.u32 %s4304_s23, 1 }
  0x26   : > { %s5159_s25 = scalar_select %p4311_p11, 1, 0 }
  0x27   : > { %s3374_s17 = sshll.u32 %s4144_s14, 5  ;;  %s5160_s1 = sld [smem:[#allocation37_spill]] }
  0x28   : > { %s322_s30 = scalar_lea.vmem [#allocation5], %s3225_s26  ;;  %s5120_s21 = scalar_lea.sflag [#allocation6], %s4307_s24 }
  0x29   : > { %s329_s8 = sshll.u32 %s322_s30, 4  ;;  %p5119_p0 = pneg %p4311_p11  ;;  %s4322_s8 = int_to_ptr.vmem [resolvable:$true] %s329_s8 }
  0x2d   : > { %s4320_s22 = scalar_lea.hbm %s5160_s1, %s3374_s17  ;;  %s3805_s17 = scalar_lea.hbm %s5160_s1, 64 }
  0x2e   : > { %s3800_s12 = scalar_lea.hbm %s4320_s22, 32  ;;  %p3806_p5 = scmp.lt.u32.totalorder %s4320_s22, %s5160_s1 }
  0x2f   : > { %p3801_p13 = scmp.ne.s32.totalorder %s4320_s22, %s3800_s12  ;;  %p3807_p7 = scmp.lt.u32.totalorder %s3805_s17, %s3800_s12 }
  0x30   : > { %p3809_p3 = scmp.lt.u32.totalorder %s3800_s12, %s4320_s22 }
  0x31   : > { %p3803_p2 = pnand %p5119_p0, %p3801_p13  ;;  %p3808_p10 = por %p3807_p7, %p3806_p5 }
  0x33   : > { %p3804_p4 = pneg %p3803_p2  ;;  %p3810_p1 = por %p3809_p3, %p3808_p10 }
  0x35   : > { %p3811_p12 = pnand %p3810_p1, %p3804_p4 }
  0x37   : > { %3814 = shalt.err (!%p3811_p12)
}
  0x38   : > { %s3815_s30 = scalar_lea.vmem %s4322_s8, 32  ;;  %s4150_s26 = smov [#allocation5]  }
  0x39   : > { %p3816_p13 = scmp.ne.s32.totalorder %s4322_s8, %s3815_s30  ;;  %s3820_s18 = sshll.u32 %s4150_s26, 4  ;;  %s3821_s18 = int_to_ptr.vmem [resolvable:$false] %s3820_s18 }
  0x3a   : > { %s3822_s6 = scalar_lea.vmem %s3821_s18, 64  ;;  %p3823_p8 = scmp.lt.s32.totalorder %s4322_s8, %s3821_s18 }
  0x3b   : > { %p3818_p2 = pnand %p3816_p13, %p5119_p0  ;;  %p3824_p5 = scmp.lt.s32.totalorder %s3822_s6, %s3815_s30 }
  0x3d   : > { %p3819_p9 = pneg %p3818_p2  ;;  %p3825_p7 = por %p3824_p5, %p3823_p8 }
  0x3f   : > { %p3826_p3 = pnand %p3825_p7, %p3819_p9 }
  0x41   : > { %3829 = shalt.err (!%p3826_p3)
}
  0x42   : > { %s4151_s11 = smov 16   ;;  %s4152_s12 = smov 1  }
  0x43   : > { %3512 = dma.hbm_to_vmem [thread:$0]  (!%p4311_p11), %s4320_s22, 32, %s4322_s8, %s5120_s21, %s4151_s11, %s4151_s11, %s4152_s12  }
  0x44   : > { %p446_p1 = scmp.lt.s32.totalorder %s4148_s15, 5  ;;  %p5161_p8 = scmp.ge.s32.totalorder %s4148_s15, 1 }
  0x45   : > { %s42_s17 = sadd.s32 1, %s4140_s13  ;;  %s104_s30 = sadd.s32 1, %s4116_s29 }
  0x46   : > { %p4356_p9 = pnand %p5161_p8, %p446_p1  ;;  %p43_p10 = scmp.ge.s32.totalorder %s42_s17, 2 }
  0x47   : > { %p111_p12 = scmp.ne.s32.totalorder %s4116_s29, %s4112_s28  ;;  %p117_p4 = scmp.ne.s32.totalorder %s4112_s28, %s4108_s27 }
  0x48   : > { %s5162_s19 = scalar_select %p4356_p9, 1, 0 }
  0x49   : > { %s4367_s26 = sand.u32 1, %s4116_s29   ;;  %s5217_s17 = smov (%p43_p10, %s42_s17), 0 }
  0x4a   : > { %5163 = sst [smem:[#allocation32_spill]] %s5217_s17  ;;  %s5164_s8 = sadd.s32 1, %s4144_s14 }
  0x4b   : > { %s5219_s8 = smov (!%p43_p10, %s5164_s8), %s4144_s14  ;;  %s101_s22 = ssub.s32 %s4140_s13, %s5217_s17 }
  0x4c   : > { %p5165_p13 = scmp.eq.s32.totalorder %s4148_s15, 0  ;;  %p47_p5 = scmp.ge.s32.totalorder %s5219_s8, 2 }
  0x4d   : > { %p102_p7 = scmp.eq.s32.totalorder %s101_s22, 0  ;;  %p5166_p3 = scmp.eq.s32.totalorder %s4274_s16, 0 }
  0x4e   : > { %p113_p2 = por %p111_p12, %p5165_p13  ;;  %p5169_p8 = scmp.lt.s32.totalorder %s4148_s15, 4 }
  0x4f   : > { %p4380_p1 = por %p117_p4, %p5166_p3  ;;  %s5221_s8 = smov (%p47_p5, %s5219_s8), 0 }
  0x50   : > { %p4386_p0 = pnand %p5169_p8, %p113_p2  ;;  %5171 = sst [smem:[#allocation34_spill]] %s5221_s8 }
  0x51   : > { %s5167_s18 = scalar_select %p4380_p1, 1, 0 }
  0x52   : > { %s5170_s27 = scalar_select %p4386_p0, 1, 0 }
  0x53   : > { %5168 = sst [smem:[#allocation33_spill]] %s5167_s18  ;;  %s49_s11 = ssub.s32 %s4144_s14, %s5221_s8 }
  0x54   : > { %s4393_s6 = scalar_select %p102_p7, %s4116_s29, %s104_s30  }
  0x55   : > { %p50_p10 = scmp.eq.s32.totalorder %s49_s11, 0  ;;  %s3487_s12 = smul.u32 384, %s4367_s26 }
  0x56   : > { %5172 = sst [smem:[#allocation35_spill]] %s4393_s6  ;;  %s5173_s22 = sadd.s32 1, %s4128_s10 }
  0x57   : > { %s4401_s21 = scalar_select %p50_p10, %s4128_s10, %s5173_s22  }
  0x58   : > { %s3488_s1 = smul.u32 6144, %s4140_s13  ;;  %s361_s17 = scalar_lea.vmem [#allocation8], %s3487_s12 }
  0x59   : > { %5174 = sst [smem:[#allocation36_spill]] %s4401_s21  ;;  %s368_s18 = sshll.u32 %s361_s17, 4  ;;  %s4409_s18 = int_to_ptr.vmem [resolvable:$true] %s368_s18 }
  0x5a   : > { %s5175_s3 = sld [smem:[#allocation38_spill]]  ;;  %p4416_p4 = pneg %p4386_p0 }
  0x60   : > { %s4407_s16 = scalar_lea.hbm %s5175_s3, %s3488_s1  ;;  %s3835_s15 = scalar_lea.hbm %s5175_s3, 12288 }
  0x61   : > { %s3830_s11 = scalar_lea.hbm %s4407_s16, 6144  ;;  %p3836_p5 = scmp.lt.u32.totalorder %s4407_s16, %s5175_s3 }
  0x62   : > { %p3831_p12 = scmp.ne.s32.totalorder %s4407_s16, %s3830_s11  ;;  %p3837_p7 = scmp.lt.u32.totalorder %s3835_s15, %s3830_s11 }
  0x63   : > { %p3839_p8 = scmp.lt.u32.totalorder %s3830_s11, %s4407_s16 }
  0x64   : > { %p3833_p13 = pnand %p4416_p4, %p3831_p12  ;;  %p3838_p3 = por %p3837_p7, %p3836_p5 }
  0x66   : > { %p3834_p2 = pneg %p3833_p13  ;;  %p3840_p10 = por %p3839_p8, %p3838_p3 }
  0x68   : > { %p3841_p1 = pnand %p3840_p10, %p3834_p2 }
  0x6a   : > { %3844 = shalt.err (!%p3841_p1)
}
  0x6b   : > { %s3845_s30 = scalar_lea.vmem %s4409_s18, 6144  ;;  %s4153_s1 = smov [#allocation8]  }
  0x6c   : > { %p3846_p12 = scmp.ne.s32.totalorder %s4409_s18, %s3845_s30  ;;  %s3850_s28 = sshll.u32 %s4153_s1, 4  ;;  %s3851_s28 = int_to_ptr.vmem [resolvable:$false] %s3850_s28 }
  0x6d   : > { %s3852_s17 = scalar_lea.vmem %s3851_s28, 12288  ;;  %p3853_p9 = scmp.lt.s32.totalorder %s4409_s18, %s3851_s28 }
  0x6e   : > { %p3848_p13 = pnand %p3846_p12, %p4416_p4  ;;  %p3854_p11 = scmp.lt.s32.totalorder %s3852_s17, %s3845_s30 }
  0x70   : > { %p3849_p6 = pneg %p3848_p13  ;;  %p3855_p5 = por %p3854_p11, %p3853_p9 }
  0x72   : > { %p3856_p7 = pnand %p3855_p5, %p3849_p6 }
  0x74   : > { %3859 = shalt.err (!%p3856_p7)
}
  0x75   : > { %s4154_s11 = smov 384   ;;  %s4155_s15 = smov 24  }
  0x76   : > { %s5177_s12 = scalar_lea.sflag [#allocation9], %s4307_s24  ;;  %s4442_s1 = sshll.u32 %s4367_s26, 7 }
  0x77   : > { %3518 = dma.hbm_to_vmem [thread:$0]  (!%p4386_p0), %s4407_s16, 6144, %s4409_s18, %s5177_s12, %s4154_s11, %s4154_s11, %s4155_s15  }
  0x78   : > { %s4445_s30 = sshll.u32 %s4140_s13, 11  ;;  %s5178_s5 = sld [smem:[#allocation39_spill]] }
  0x79   : > { %s403_s8 = scalar_lea.vmem [#allocation11], %s4442_s1  ;;  %s5139_s16 = scalar_lea.sflag [#allocation12], %s4307_s24 }
  0x7a   : > { %s410_s21 = sshll.u32 %s403_s8, 4  ;;  %s4454_s21 = int_to_ptr.vmem [resolvable:$true] %s410_s21 }
  0x7e   : > { %s4451_s3 = scalar_lea.hbm %s5178_s5, %s4445_s30  ;;  %s3865_s12 = scalar_lea.hbm %s5178_s5, 4096 }
  0x7f   : > { %s3860_s18 = scalar_lea.hbm %s4451_s3, 2048  ;;  %p3866_p1 = scmp.lt.u32.totalorder %s4451_s3, %s5178_s5 }
  0x80   : > { %p3861_p6 = scmp.ne.s32.totalorder %s4451_s3, %s3860_s18  ;;  %p3867_p2 = scmp.lt.u32.totalorder %s3865_s12, %s3860_s18 }
  0x81   : > { %p3869_p8 = scmp.lt.u32.totalorder %s3860_s18, %s4451_s3 }
  0x82   : > { %p3863_p11 = pnand %p3861_p6, %p4416_p4  ;;  %p3868_p3 = por %p3867_p2, %p3866_p1 }
  0x84   : > { %p3864_p9 = pneg %p3863_p11  ;;  %p3870_p10 = por %p3869_p8, %p3868_p3 }
  0x86   : > { %p3871_p12 = pnand %p3870_p10, %p3864_p9 }
  0x88   : > { %3874 = shalt.err (!%p3871_p12)
}
  0x89   : > { %s3875_s8 = scalar_lea.vmem %s4454_s21, 2048  ;;  %s4156_s11 = smov [#allocation11]  }
  0x8a   : > { %p3876_p13 = scmp.ne.s32.totalorder %s4454_s21, %s3875_s8  ;;  %s3880_s15 = sshll.u32 %s4156_s11, 4  ;;  %s3881_s15 = int_to_ptr.vmem [resolvable:$false] %s3880_s15 }
  0x8b   : > { %s3882_s28 = scalar_lea.vmem %s3881_s15, 4096  ;;  %p3883_p6 = scmp.lt.s32.totalorder %s4454_s21, %s3881_s15 }
  0x8c   : > { %p3878_p5 = pnand %p3876_p13, %p4416_p4  ;;  %p3884_p11 = scmp.lt.s32.totalorder %s3882_s28, %s3875_s8 }
  0x8e   : > { %p3879_p7 = pneg %p3878_p5  ;;  %p3885_p1 = por %p3884_p11, %p3883_p6 }
  0x90   : > { %p3886_p2 = pnand %p3885_p1, %p3879_p7 }
  0x92   : > { %3889 = shalt.err (!%p3886_p2)
}
  0x93   : > { %s4157_s18 = smov 128   ;;  %s4158_s12 = smov 8  }
  0x94   : > { %3524 = dma.hbm_to_vmem [thread:$0]  (!%p4386_p0), %s4451_s3, 2048, %s4454_s21, %s5139_s16, %s4157_s18, %s4157_s18, %s4158_s12  }
  0x95   : > { %s3222_s17 = sshll.u32 %s4304_s23, 4  ;;  %s3373_s8 = sshll.u32 %s4144_s14, 8 }
  0x96   : > { %s4488_s28 = scalar_lea.hbm %s5100_s0, %s3373_s8  ;;  %s301_s5 = scalar_lea.vmem [#allocation2], %s3222_s17 }
  0x97   : > { %s308_s10 = sshll.u32 %s301_s5, 4  ;;  %s3228_s6 = sshll.u32 %s4367_s26, 3  ;;  %s4491_s10 = int_to_ptr.vmem [resolvable:$true] %s308_s10 }
  0x98   : > { %s298_s29 = scalar_lea.sflag [#allocation3], %s4304_s23  ;;  %s3890_s20 = scalar_lea.hbm %s4488_s28, 256 }
  0x99   : > { %p3891_p9 = scmp.ne.s32.totalorder %s4488_s28, %s3890_s20  ;;  %p5179_p3 = scmp.ne.s32.totalorder %s5159_s25, 0 }
  0x9a   : > { %s3895_s8 = scalar_lea.hbm %s5100_s0, 512  ;;  %p3896_p13 = scmp.lt.u32.totalorder %s4488_s28, %s5100_s0 }
  0x9b   : > { %p5180_p8 = pneg %p5179_p3  ;;  %p3897_p5 = scmp.lt.u32.totalorder %s3895_s8, %s3890_s20 }
  0x9c   : > { %p3899_p6 = scmp.lt.u32.totalorder %s3890_s20, %s4488_s28 }
  0x9d   : > { %p3893_p10 = pnand %p3891_p9, %p5180_p8  ;;  %p3898_p7 = por %p3897_p5, %p3896_p13 }
  0x9f   : > { %p3894_p12 = pneg %p3893_p10  ;;  %p3900_p11 = por %p3899_p6, %p3898_p7 }
  0xa1   : > { %p3901_p1 = pnand %p3900_p11, %p3894_p12 }
  0xa3   : > { %3904 = shalt.err (!%p3901_p1)
}
  0xa4   : > { %s3905_s5 = scalar_lea.vmem %s4491_s10, 256  ;;  %p5181_p9 = pmov %p5180_p8 }
  0xa5   : > { %p3906_p2 = scmp.ne.s32.totalorder %s4491_s10, %s3905_s5  ;;  %s4159_s17 = smov [#allocation2]  }
  0xa6   : > { %s3910_s3 = sshll.u32 %s4159_s17, 4  ;;  %s3911_s3 = int_to_ptr.vmem [resolvable:$false] %s3910_s3 }
  0xa7   : > { %p3908_p8 = pnand %p3906_p2, %p5181_p9  ;;  %s3912_s21 = scalar_lea.vmem %s3911_s3, 512 }
  0xa8   : > { %p3913_p0 = scmp.lt.s32.totalorder %s4491_s10, %s3911_s3  ;;  %p3914_p13 = scmp.lt.s32.totalorder %s3912_s21, %s3905_s5 }
  0xa9   : > { %p3909_p10 = pneg %p3908_p8 }
  0xaa   : > { %p3915_p5 = por %p3914_p13, %p3913_p0 }
  0xac   : > { %p3916_p7 = pnand %p3915_p5, %p3909_p10 }
  0xae   : > { %3919 = shalt.err (!%p3916_p7)
}
  0xaf   : > { %3509 = dma.hbm_to_vmem [thread:$0]  (!%p5179_p3), %s4488_s28, 256, %s4491_s10, %s298_s29, %s4157_s18, %s4157_s18, %s4158_s12  }
  0xb0   : > { %s3229_s20 = sshll.u32 %s4140_s13, 7  ;;  %s343_s8 = scalar_lea.vmem [#allocation7], %s3228_s6 }
  0xb1   : > { %s350_s11 = sshll.u32 %s343_s8, 4  ;;  %s348_s17 = scalar_lea.hbm %s5102_s2, %s3229_s20  ;;  %s351_s11 = int_to_ptr.vmem [resolvable:$true] %s350_s11 }
  0xb2   : > { %s3920_s25 = scalar_lea.hbm %s348_s17, 128  ;;  %s3925_s21 = scalar_lea.hbm %s5102_s2, 256 }
  0xb3   : > { %p3921_p0 = scmp.ne.s32.totalorder %s348_s17, %s3920_s25  ;;  %p3926_p3 = scmp.lt.u32.totalorder %s348_s17, %s5102_s2 }
  0xb4   : > { %p3927_p11 = scmp.lt.u32.totalorder %s3925_s21, %s3920_s25  ;;  %p3929_p2 = scmp.lt.u32.totalorder %s3920_s25, %s348_s17 }
  0xb5   : > { %p3923_p12 = pnand %p3921_p0, %p4416_p4 }
  0xb6   : > { %p3928_p1 = por %p3927_p11, %p3926_p3 }
  0xb7   : > { %p3924_p6 = pneg %p3923_p12 }
  0xb8   : > { %p3930_p9 = por %p3929_p2, %p3928_p1 }
  0xba   : > { %p3931_p8 = pnand %p3930_p9, %p3924_p6 }
  0xbc   : > { %3934 = shalt.err (!%p3931_p8)
}
  0xbd   : > { %s3935_s10 = scalar_lea.vmem %s351_s11, 128  ;;  %s4160_s26 = smov [#allocation7]  }
  0xbe   : > { %p3936_p10 = scmp.ne.s32.totalorder %s351_s11, %s3935_s10  ;;  %s3940_s6 = sshll.u32 %s4160_s26, 4  ;;  %s3941_s6 = int_to_ptr.vmem [resolvable:$false] %s3940_s6 }
  0xbf   : > { %s3942_s18 = scalar_lea.vmem %s3941_s6, 256  ;;  %p3943_p7 = scmp.lt.s32.totalorder %s351_s11, %s3941_s6 }
  0xc0   : > { %p3938_p13 = pnand %p3936_p10, %p4416_p4  ;;  %p3944_p0 = scmp.lt.s32.totalorder %s3942_s18, %s3935_s10 }
  0xc2   : > { %p3939_p5 = pneg %p3938_p13  ;;  %p3945_p12 = por %p3944_p0, %p3943_p7 }
  0xc4   : > { %p3946_p3 = pnand %p3945_p12, %p3939_p5 }
  0xc6   : > { %3949 = shalt.err (!%p3946_p3)
}
  0xc7   : > { %p5182_p11 = scmp.ne.s32.totalorder %s5170_s27, 0  ;;  %s5183_s16 = scalar_lea.sflag [#allocation6], %s4307_s24 }
  0xc8   : > { %s4546_s20 = scalar_lea.hbm %s5104_s4, %s4445_s30  ;;  %s382_s8 = scalar_lea.vmem [#allocation10], %s4442_s1 }
  0xc9   : > { %3515 = dma.hbm_to_vmem [thread:$0]  (!%p5182_p11), %s348_s17, 128, %s351_s11, %s5183_s16  }
  0xca   : > { %s389_s15 = sshll.u32 %s382_s8, 4  ;;  %s3950_s5 = scalar_lea.hbm %s4546_s20, 2048  ;;  %s4549_s15 = int_to_ptr.vmem [resolvable:$true] %s389_s15 }
  0xcb   : > { %p3951_p6 = scmp.ne.s32.totalorder %s4546_s20, %s3950_s5  ;;  %s3955_s17 = scalar_lea.hbm %s5104_s4, 4096 }
  0xcc   : > { %p3956_p9 = scmp.lt.u32.totalorder %s4546_s20, %s5104_s4  ;;  %p3957_p8 = scmp.lt.u32.totalorder %s3955_s17, %s3950_s5 }
  0xcd   : > { %p3953_p1 = pnand %p3951_p6, %p4416_p4  ;;  %p3959_p13 = scmp.lt.u32.totalorder %s3950_s5, %s4546_s20 }
  0xce   : > { %p3958_p10 = por %p3957_p8, %p3956_p9 }
  0xcf   : > { %p3954_p2 = pneg %p3953_p1 }
  0xd0   : > { %p3960_p5 = por %p3959_p13, %p3958_p10 }
  0xd2   : > { %p3961_p7 = pnand %p3960_p5, %p3954_p2 }
  0xd4   : > { %3964 = shalt.err (!%p3961_p7)
}
  0xd5   : > { %s3965_s21 = scalar_lea.vmem %s4549_s15, 2048  ;;  %s4161_s29 = smov [#allocation10]  }
  0xd6   : > { %p3966_p0 = scmp.ne.s32.totalorder %s4549_s15, %s3965_s21  ;;  %s3970_s10 = sshll.u32 %s4161_s29, 4  ;;  %s3971_s10 = int_to_ptr.vmem [resolvable:$false] %s3970_s10 }
  0xd7   : > { %s3972_s26 = scalar_lea.vmem %s3971_s10, 4096  ;;  %p3973_p6 = scmp.lt.s32.totalorder %s4549_s15, %s3971_s10 }
  0xd8   : > { %p3968_p12 = pnand %p3966_p0, %p4416_p4  ;;  %p3974_p1 = scmp.lt.s32.totalorder %s3972_s26, %s3965_s21 }
  0xda   : > { %p3969_p3 = pneg %p3968_p12  ;;  %p3975_p9 = por %p3974_p1, %p3973_p6 }
  0xdc   : > { %p3976_p8 = pnand %p3975_p9, %p3969_p3 }
  0xde   : > { %3979 = shalt.err (!%p3976_p8)
}
  0xdf   : > { %s4162_s6 = smov 64   ;;  %s4163_s18 = smov 4  }
  0xe0   : > { %s5184_s16 = scalar_lea.sflag [#allocation9], %s4307_s24  ;;  %s4581_s8 = scalar_lea.hbm %s5107_s7, %s4445_s30 }
  0xe1   : > { %3521 = dma.hbm_to_vmem [thread:$0]  (!%p5182_p11), %s4546_s20, 2048, %s4549_s15, %s5184_s16, %s4162_s6, %s4162_s6, %s4163_s18  }
  0xe2   : > { %s431_s5 = scalar_lea.vmem [#allocation13], %s4442_s1  ;;  %s3980_s11 = scalar_lea.hbm %s4581_s8, 2048 }
  0xe3   : > { %s438_s25 = sshll.u32 %s431_s5, 4  ;;  %p3981_p2 = scmp.ne.s32.totalorder %s4581_s8, %s3980_s11  ;;  %s4584_s25 = int_to_ptr.vmem [resolvable:$true] %s438_s25 }
  0xe4   : > { %s3985_s15 = scalar_lea.hbm %s5107_s7, 4096  ;;  %p3986_p5 = scmp.lt.u32.totalorder %s4581_s8, %s5107_s7 }
  0xe5   : > { %p3983_p10 = pnand %p3981_p2, %p4416_p4  ;;  %p3987_p7 = scmp.lt.u32.totalorder %s3985_s15, %s3980_s11 }
  0xe6   : > { %p3989_p12 = scmp.lt.u32.totalorder %s3980_s11, %s4581_s8 }
  0xe7   : > { %p3984_p13 = pneg %p3983_p10  ;;  %p3988_p0 = por %p3987_p7, %p3986_p5 }
  0xe9   : > { %p3990_p3 = por %p3989_p12, %p3988_p0 }
  0xeb   : > { %p3991_p6 = pnand %p3990_p3, %p3984_p13 }
  0xed   : > { %3994 = shalt.err (!%p3991_p6)
}
  0xee   : > { %s3995_s1 = scalar_lea.vmem %s4584_s25, 2048  ;;  %s4164_s3 = smov [#allocation13]  }
  0xef   : > { %p3996_p1 = scmp.ne.s32.totalorder %s4584_s25, %s3995_s1  ;;  %s4000_s21 = sshll.u32 %s4164_s3, 4  ;;  %s4001_s21 = int_to_ptr.vmem [resolvable:$false] %s4000_s21 }
  0xf0   : > { %s4002_s29 = scalar_lea.vmem %s4001_s21, 4096  ;;  %p4003_p2 = scmp.lt.s32.totalorder %s4584_s25, %s4001_s21 }
  0xf1   : > { %p3998_p9 = pnand %p3996_p1, %p4416_p4  ;;  %p4004_p10 = scmp.lt.s32.totalorder %s4002_s29, %s3995_s1 }
  0xf3   : > { %p3999_p8 = pneg %p3998_p9  ;;  %p4005_p5 = por %p4004_p10, %p4003_p2 }
  0xf5   : > { %p4006_p7 = pnand %p4005_p5, %p3999_p8 }
  0xf7   : > { %4009 = shalt.err (!%p4006_p7)
}
  0xf8   : > { %s5185_s10 = scalar_lea.sflag [#allocation12], %s4307_s24  ;;  %p5186_p4 = scmp.ne.s32.totalorder %s5162_s19, 0 }
  0xf9   : > { %3527 = dma.hbm_to_vmem [thread:$0]  (!%p5182_p11), %s4581_s8, 2048, %s4584_s25, %s5185_s10, %s4162_s6, %s4162_s6, %s4163_s18  }
  0xfa   : > { %450 = sbr.rel (%p5186_p4) target bundleno = 2670 (0xa6e), region = 52  ;;  %s5187_s22 = sld [smem:[#allocation29_spill]] (!%p5186_p4) }
  0xfb   : > { %s4615_s26 = sand.u32 (!%p5186_p4), 1, %s4124_s9  }
  0xfc   : > { %s3241_s16 = sshll.u32 (!%p5186_p4), %s4615_s26, 4  ;;  %s453_s27 = scalar_lea.sflag (!%p5186_p4), [#allocation3], %s4615_s26 }
  0xfd   : > { %s4621_s12 = scalar_lea.vmem (!%p5186_p4), [#allocation2], %s3241_s16 }
 0x100   : > { %p5188_p13 = scmp.ne.s32.totalorder (!%p5186_p4), %s5187_s22, 0 }
 0x102   : > { %4083 = dma.done.wait (%p5188_p13), %s453_s27, 256  }
 0x103   : > { %4085 = vsyncadd (%p5188_p13), %s453_s27, 4294967040  ;;  %s5189_s24 = sld [smem:[#allocation28_spill]]  ;;  %s3242_s6 = sshll.u32 %s4615_s26, 1 }
 0x104   : > { %s4629_s28 = scalar_lea.vmem [#allocation5], %s3242_s6 }
 0x109   : > { %s461_s19 = sand.u32 1, %s5189_s24  }
 0x10a   : > { %s462_s18 = scalar_lea.sflag [#allocation6], %s461_s19 }
 0x10b   : > { %4087 = dma.done.wait (%p5188_p13), %s462_s18, 32  }
 0x10c   : > { %4089 = vsyncadd (%p5188_p13), %s462_s18, 4294967264  ;;  %s5190_s8 = sld [smem:[#allocation21_spill]]  ;;  %s5191_s5 = sld [smem:[#allocation33_spill]] }
 0x112   : > { %s472_s25 = sand.u32 1, %s5190_s8   ;;  %p5192_p11 = scmp.ne.s32.totalorder %s5191_s5, 0 }
 0x113   : > { %s3243_s11 = sshll.u32 %s472_s25, 3 }
 0x114   : > { %s4636_s17 = scalar_lea.vmem [#allocation7], %s3243_s11 }
 0x115   : > { %4091 = dma.done.wait (%p5192_p11), %s462_s18, 128  }
 0x116   : > { %4093 = vsyncadd (%p5192_p11), %s462_s18, 4294967168  ;;  %s3489_s20 = smul.u32 384, %s472_s25  ;;  %s480_s15 = scalar_lea.sflag [#allocation9], %s461_s19 }
 0x118   : > { %s4642_s23 = scalar_lea.vmem [#allocation8], %s3489_s20 }
 0x119   : > { %4095 = dma.done.wait (%p5192_p11), %s480_s15, 8192  }
 0x11a   : > { %4097 = vsyncadd (%p5192_p11), %s480_s15, 4294959104  ;;  %s3244_s30 = sshll.u32 %s472_s25, 7  ;;  %s498_s3 = scalar_lea.sflag [#allocation12], %s461_s19 }
 0x11b   : > { %s4648_s1 = scalar_lea.vmem [#allocation10], %s3244_s30  ;;  %s4650_s21 = scalar_lea.vmem [#allocation11], %s3244_s30 }
 0x11c   : > { %4099 = dma.done.wait (%p5192_p11), %s498_s3, 4096  }
 0x11d   : > { %4101 = vsyncadd (%p5192_p11), %s498_s3, 4294963200  ;;  %s5193_s29 = sld [smem:[#allocation25_spill]]  ;;  %s5194_s6 = sld [smem:[#allocation40_spill]] }
 0x11e   : > { %s4663_s8 = scalar_lea.vmem [#allocation13], %s3244_s30  ;;  %s4667_s19 = scalar_lea.vmem [#allocation14], %s3241_s16 }
 0x123   : > { %p579_p0 = scmp.lt.s32.totalorder %s5193_s29, 1  ;;  %p3249_p12 = scmp.ne.s32.totalorder %s5193_s29, 0 }
 0x124   : > { %v589_v0 = vld [vmem:[%s4621_s12] sm:$0xff] (!%p3249_p12)  ;;  %v590_v1 = vld [vmem:[%s4621_s12 + $0x8] sm:$0xff] (!%p3249_p12) }
 0x125   : > { %s580_s10 = scalar_select %p579_p0, %s5193_s29, 1 }
 0x126   : > { %588 = sbr.rel (%p3249_p12) target bundleno = 301 (0x12d), region = 84  ;;  %591 = vst [vmem:[%s4667_s19] sm:$0xff] (!%p3249_p12), %v589_v0  ;;  %592 = vst [vmem:[%s4667_s19 + $0x8] sm:$0xff] (!%p3249_p12), %v590_v1 }
 0x127   : > { %s3248_s22 = sshll.u32 %s580_s10, 1 }
 0x128   : > { %s4661_s18 = scalar_lea.vmem %s5194_s6, %s3248_s22 }
 0x12d PF: > { %v593_v2 = vld [vmem:[%s4667_s19] sm:$0xff]  ;;  %v594_v3 = vld [vmem:[%s4667_s19 + $0x8] sm:$0xff]  ;;  %v4165_v38 = vmov 0   ;;  %v619_v50 = vlaneseq  ;;  %vm4167_vm0 = vmmov 0   ;;  %vm1987_vm1 = vcmask 1043456   ;;  %s5195_s16 = sld [smem:[#allocation26_spill]] }
 0x12e   : > { %596 = vadd.xlane.f32.xlu0 %v593_v2  ;;  %v3637_v4 = vld [vmem:[%s4642_s23 + $0x4] ss:$24 sps:$4 sm:$0xff]   ;;  %v3639_v5 = vld [vmem:[%s4642_s23] ss:$24 sps:$4 sm:$0xff]   ;;  %v3643_v8 = vld [vmem:[%s4642_s23 + $0x34] ss:$24 sps:$4 sm:$0xff]   ;;  %952 = vmatprep.mubr.bf16.mxu0 %v4165_v38 }
 0x12f   : > { %v3640_v6 = vld [vmem:[%s4642_s23 + $0xc] ss:$24 sps:$4 sm:$0xff]   ;;  %v3642_v7 = vld [vmem:[%s4642_s23 + $0x8] ss:$24 sps:$4 sm:$0xff]   ;;  %920 = vmatprep.subr.bf16.mxu0 %v3637_v4  ;;  %v3646_v10 = vld [vmem:[%s4642_s23 + $0x3c] ss:$24 sps:$4 sm:$0xff]   ;;  %995 = vmatprep.mubr.bf16.mxu1 %v4165_v38 }
 0x130   : > { %v3645_v9 = vld [vmem:[%s4642_s23 + $0x30] ss:$24 sps:$4 sm:$0xff]   ;;  %963 = vmatprep.subr.bf16.mxu1 %v3640_v6  ;;  %921 = vmatpush1.bf16.msra.mxu0 %v3639_v5  ;;  %v3649_v20 = vld [vmem:[%s4642_s23 + $0x64] ss:$24 sps:$4 sm:$0xff]   ;;  %v3651_v21 = vld [vmem:[%s4642_s23 + $0x60] ss:$24 sps:$4 sm:$0xff]  }
 0x131   : > { %964 = vmatpush1.bf16.msra.mxu1 %v3642_v7  ;;  %922 = vmatprep.subr.bf16.mxu0 %v3643_v8  ;;  %v3648_v19 = vld [vmem:[%s4642_s23 + $0x38] ss:$24 sps:$4 sm:$0xff]   ;;  %v3652_v22 = vld [vmem:[%s4642_s23 + $0x6c] ss:$24 sps:$4 sm:$0xff]   ;;  %v3654_v23 = vld [vmem:[%s4642_s23 + $0x68] ss:$24 sps:$4 sm:$0xff]  }
 0x132   : > { %598 = vadd.xlane.f32.xlu0 %v594_v3  ;;  %965 = vmatprep.subr.bf16.mxu1 %v3646_v10  ;;  %v3655_v24 = vld [vmem:[%s4642_s23 + $0x94] ss:$24 sps:$4 sm:$0xff]   ;;  %v3657_v25 = vld [vmem:[%s4642_s23 + $0x90] ss:$24 sps:$4 sm:$0xff]   ;;  %v3661_v28 = vld [vmem:[%s4642_s23 + $0xc4] ss:$24 sps:$4 sm:$0xff]  }
 0x133   : > { %v3658_v26 = vld [vmem:[%s4642_s23 + $0x9c] ss:$24 sps:$4 sm:$0xff]   ;;  %v3660_v27 = vld [vmem:[%s4642_s23 + $0x98] ss:$24 sps:$4 sm:$0xff]   ;;  %v3664_v30 = vld [vmem:[%s4642_s23 + $0xcc] ss:$24 sps:$4 sm:$0xff]  }
 0x134   : > { %923 = vmatpush1.bf16.msra.mxu0 %v3645_v9  ;;  %v3663_v29 = vld [vmem:[%s4642_s23 + $0xc0] ss:$24 sps:$4 sm:$0xff]   ;;  %v3667_v32 = vld [vmem:[%s4642_s23 + $0xf4] ss:$24 sps:$4 sm:$0xff]   ;;  %v3669_v34 = vld [vmem:[%s4642_s23 + $0xf0] ss:$24 sps:$4 sm:$0xff]  }
 0x135   : > { %966 = vmatpush1.bf16.msra.mxu1 %v3648_v19  ;;  %924 = vmatprep.subr.bf16.mxu0 %v3649_v20  ;;  %v3666_v31 = vld [vmem:[%s4642_s23 + $0xc8] ss:$24 sps:$4 sm:$0xff]   ;;  %v3670_v33 = vld [vmem:[%s4642_s23 + $0xfc] ss:$24 sps:$4 sm:$0xff]   ;;  %v3672_v35 = vld [vmem:[%s4642_s23 + $0xf8] ss:$24 sps:$4 sm:$0xff]  }
 0x136   : > { %967 = vmatprep.subr.bf16.mxu1 %v3652_v22  ;;  %v3673_v36 = vld [vmem:[%s4642_s23 + $0x124] ss:$24 sps:$4 sm:$0xff]   ;;  %v3675_v39 = vld [vmem:[%s4642_s23 + $0x120] ss:$24 sps:$4 sm:$0xff]   ;;  %v3679_v41 = vld [vmem:[%s4642_s23 + $0x154] ss:$24 sps:$4 sm:$0xff]  }
 0x137   : > { %v3676_v37 = vld [vmem:[%s4642_s23 + $0x12c] ss:$24 sps:$4 sm:$0xff]   ;;  %v3678_v40 = vld [vmem:[%s4642_s23 + $0x128] ss:$24 sps:$4 sm:$0xff]   ;;  %v3682_v42 = vld [vmem:[%s4642_s23 + $0x15c] ss:$24 sps:$4 sm:$0xff]  }
 0x138   : > { %925 = vmatpush1.bf16.msra.mxu0 %v3651_v21  ;;  %v3681_v43 = vld [vmem:[%s4642_s23 + $0x150] ss:$24 sps:$4 sm:$0xff]   ;;  %v3687_v45 = vld [vmem:[%s4642_s23 + $0x14] ss:$24 sps:$4 sm:$0xff]   ;;  %v4719_v53 = vshrl.u32 %v619_v50, 7  ;;  %v4166_v19 = vmov 0.0  }
 0x139   : > { %968 = vmatpush1.bf16.msra.mxu1 %v3654_v23  ;;  %926 = vmatprep.subr.bf16.mxu0 %v3655_v24  ;;  %v3684_v44 = vld [vmem:[%s4642_s23 + $0x158] ss:$24 sps:$4 sm:$0xff]   ;;  %v3690_v5 = vld [vmem:[%s4642_s23 + $0x44] ss:$24 sps:$4 sm:$0xff]   ;;  %v3693_v7 = vld [vmem:[%s4642_s23 + $0x74] ss:$24 sps:$4 sm:$0xff]  }
 0x13a   : > { %969 = vmatprep.subr.bf16.mxu1 %v3658_v26  ;;  %v621_v54 = vsub.s32 0, %v4719_v53  ;;  %v4723_v55 = vld [vmem:[%s4636_s17] sm:$0xff]  ;;  %v627_v59 = vsub.s32 1, %v4719_v53  ;;  %v4168_v20 = vmov 1983009808   ;;  %vm1935_vm2 = vcmask 64512  }
 0x13b   : > { %v3688_v6 = vld [vmem:[%s4642_s23 + $0x40] ss:$24 sps:$4 sm:$0xff]   ;;  %v3691_v8 = vld [vmem:[%s4642_s23 + $0x70] ss:$24 sps:$4 sm:$0xff]   ;;  %v3696_v9 = vld [vmem:[%s4642_s23 + $0xa4] ss:$24 sps:$4 sm:$0xff]   ;;  %v1055_v21 = vunpack.c.l.s4 %v4168_v20 }
 0x13c   : > { %927 = vmatpush1.bf16.msra.mxu0 %v3657_v25  ;;  %v622_v58 = vrot.slane %v4723_v55, %v621_v54  ;;  %v628_v63 = vrot.slane %v4723_v55, %v627_v59  ;;  %v3694_v10 = vld [vmem:[%s4642_s23 + $0xa0] ss:$24 sps:$4 sm:$0xff]   ;;  %v4169_v23 = vmov 1934713408   ;;  %s5196_s12 = sld [smem:[#allocation30_spill]]  ;;  %s2993_s5 = sshll.u32 %s4667_s19, 4  ;;  %s5034_s5 = int_to_ptr.vmem [resolvable:$true] %s2993_s5 }
 0x13d   : > { %970 = vmatpush1.bf16.msra.mxu1 %v3660_v27  ;;  %928 = vmatprep.subr.bf16.mxu0 %v3661_v28  ;;  %v1056_v22 = vunpack.c.0.s8 %v1055_v21  ;;  %v1086_v24 = vunpack.c.l.s4 %v4169_v23  ;;  %s2980_s15 = scalar_lea.sflag [#allocation4], %s4615_s26  ;;  %s4170_s30 = smov [#allocation14]  }
 0x13e   : > { %971 = vmatprep.subr.bf16.mxu1 %v3664_v30 }
 0x13f   : > { %v4754_v25 = vsub.s32 %v1056_v22, %v4719_v53  ;;  %v1087_v26 = vunpack.c.0.s8 %v1086_v24 }
 0x140   : > { %929 = vmatpush1.bf16.msra.mxu0 %v3663_v29 }
 0x141   : > { %972 = vmatpush1.bf16.msra.mxu1 %v3666_v31  ;;  %930 = vmatprep.subr.bf16.mxu0 %v3667_v32 }
 0x142   : > { %973 = vmatprep.subr.bf16.mxu1 %v3670_v33  ;;  %p5198_p6 = scmp.ne.s32.totalorder %s5196_s12, 0 }
 0x144   : > { %931 = vmatpush1.bf16.msra.mxu0 %v3669_v34  ;;  %v4759_v34 = vsub.s32 %v1087_v26, %v4719_v53 }
 0x145   : > { %974 = vmatpush1.bf16.msra.mxu1 %v3672_v35  ;;  %932 = vmatprep.subr.bf16.mxu0 %v3673_v36 }
 0x146   : > { %975 = vmatprep.subr.bf16.mxu1 %v3676_v37 }
 0x148   : > { %933 = vmatpush1.bf16.msra.mxu0 %v3675_v39 }
 0x149   : > { %976 = vmatpush1.bf16.msra.mxu1 %v3678_v40  ;;  %934 = vmatprep.subr.bf16.mxu0 %v3679_v41 }
 0x14a   : > { %977 = vmatprep.subr.bf16.mxu1 %v3682_v42 }
 0x14c   : > { %935 = vmatpush1.bf16.msra.mxu0 %v3681_v43 }
 0x14d   : > { %978 = vmatpush1.bf16.msra.mxu1 %v3684_v44  ;;  %1006 = vmatprep.subr.bf16.mxu0 %v3687_v45 }
 0x14e   : > { %3439 = vmatprep.subr.bf16.mxu1 %v4166_v19 }
 0x1bb   : > { %v597_v11 = vpop.xlane.xlu0 %596 }
 0x1bc   : > { %v601_v12 = vmul.f32 0.0078125, %v597_v11  ;;  %v3699_v11 = vld [vmem:[%s4642_s23 + $0xd4] ss:$24 sps:$4 sm:$0xff]  }
 0x1be   : > { %v4683_v13 = vsub.f32 %v593_v2, %v601_v12  ;;  %v3697_v12 = vld [vmem:[%s4642_s23 + $0xd0] ss:$24 sps:$4 sm:$0xff]  }
 0x1bf   : > { %v599_v14 = vpop.xlane.xlu0 %598 }
 0x1c0   : > { %v602_v15 = vmul.f32 0.0078125, %v599_v14  ;;  %v605_v16 = vmul.f32 %v4683_v13, %v4683_v13  ;;  %v3700_v14 = vld [vmem:[%s4642_s23 + $0x100] ss:$24 sps:$4 sm:$0xff]  }
 0x1c2   : > { %v4687_v17 = vsub.f32 %v594_v3, %v602_v15  ;;  %607 = vadd.xlane.f32.xlu1 %v605_v16  ;;  %v3685_v3 = vld [vmem:[%s4642_s23 + $0x10] ss:$24 sps:$4 sm:$0xff]   ;;  %v3705_v15 = vld [vmem:[%s4642_s23 + $0x134] ss:$24 sps:$4 sm:$0xff]  }
 0x1c3   : > { %v3703_v16 = vld [vmem:[%s4642_s23 + $0x130] ss:$24 sps:$4 sm:$0xff]  }
 0x1c4   : > { %v606_v18 = vmul.f32 %v4687_v17, %v4687_v17 }
 0x1c6   : > { %609 = vadd.xlane.f32.xlu1 %v606_v18  ;;  %v3706_v18 = vld [vmem:[%s4642_s23 + $0x160] ss:$24 sps:$4 sm:$0xff]  }
 0x24f   : > { %v608_v46 = vpop.xlane.xlu1 %607 }
 0x250   : > { %v611_v47 = vmul.f32 0.0078125, %v608_v46 }
 0x252   : > { %v613_v48 = vadd.f32 1e-05, %v611_v47 }
 0x253   : > { %v610_v49 = vpop.xlane.xlu1 %609 }
 0x254   : > { %3765 = vrsqrt.f32 %v613_v48  ;;  %v612_v51 = vmul.f32 0.0078125, %v610_v49 }
 0x256   : > { %v614_v52 = vadd.f32 1e-05, %v612_v51 }
 0x258   : > { %3767 = vrsqrt.f32 %v614_v52 }
 0x25e   : > { %v3766_v56 = vpop.eup %3765 }
 0x25f   : > { %v617_v57 = vmul.f32 %v3766_v56, %v4683_v13  ;;  %v3702_v13 = vld [vmem:[%s4642_s23 + $0x104] ss:$24 sps:$4 sm:$0xff]  }
 0x261   : > { %v623_v62 = vmul.f32 %v622_v58, %v617_v57 }
 0x262   : > { %v3768_v60 = vpop.eup %3767 }
 0x263   : > { %v618_v61 = vmul.f32 %v3768_v60, %v4687_v17  ;;  %v629_v1 = vadd.f32 %v628_v63, %v623_v62  ;;  %v3708_v17 = vld [vmem:[%s4642_s23 + $0x164] ss:$24 sps:$4 sm:$0xff]   ;;  %s4010_s23 = scalar_lea.vmem %s5034_s5, 256 }
 0x264   : > { %p4011_p3 = scmp.ne.s32.totalorder %s5034_s5, %s4010_s23 }
 0x265   : > { %v624_v0 = vmul.f32 %v622_v58, %v618_v61 }
 0x266   : > { %p4012_p1 = pnand %p4011_p3, %p5198_p6 }
 0x267   : > { %v630_v2 = vadd.f32 %v628_v63, %v624_v0 }
 0x268   : > { %p4013_p9 = pneg %p4012_p1 }
 0x269   : > { %v631_v4 = vpack.c.bf16 %v630_v2, %v629_v1 }
 0x26b   : > { %953 = vmatmul.mubr.bf16.vlgmr.msra.gmra.mrb[0].mxu0 %v631_v4  ;;  %996 = vmatmul.mubr.bf16.vlgmr.msra.gmra.mrb[0].mxu1 %v631_v4 }
 0x26c   : > { %1007 = vmatpush1.bf16.msra.mxu0 %v3685_v3  ;;  %1038 = vmatprep.mubr.bf16.mxu0 %v4165_v38 }
 0x26d   : > { %1008 = vmatprep.subr.bf16.mxu0 %v3690_v5  ;;  %3441 = vmatprep.mubr.msk.bf16.mxu1 %vm4167_vm0, %v4166_v19 }
 0x270   : > { %1009 = vmatpush1.bf16.msra.mxu0 %v3688_v6 }
 0x271   : > { %1010 = vmatprep.subr.bf16.mxu0 %v3693_v7 }
 0x274   : > { %1011 = vmatpush1.bf16.msra.mxu0 %v3691_v8 }
 0x275   : > { %1012 = vmatprep.subr.bf16.mxu0 %v3696_v9 }
 0x278   : > { %1013 = vmatpush1.bf16.msra.mxu0 %v3694_v10 }
 0x279   : > { %1014 = vmatprep.subr.bf16.mxu0 %v3699_v11 }
 0x27c   : > { %1015 = vmatpush1.bf16.msra.mxu0 %v3697_v12 }
 0x27d   : > { %1016 = vmatprep.subr.bf16.mxu0 %v3702_v13 }
 0x280   : > { %1017 = vmatpush1.bf16.msra.mxu0 %v3700_v14 }
 0x281   : > { %1018 = vmatprep.subr.bf16.mxu0 %v3705_v15 }
 0x284   : > { %1019 = vmatpush1.bf16.msra.mxu0 %v3703_v16 }
 0x285   : > { %1020 = vmatprep.subr.bf16.mxu0 %v3708_v17 }
 0x288   : > { %1021 = vmatpush1.bf16.msra.mxu0 %v3706_v18 }
 0x28b   : > { %1039 = vmatmul.mubr.bf16.vlgmr.msra.gmra.mrb[4].mxu0 %v631_v4 }
 0x33e   : > { %v954_v27 = vpop.f32.mrb[0].mxu0  ;;  %v997_v28 = vpop.f32.mrb[0].mxu1 }
 0x33f   : > { %v1049_v29 = vmul.f32 0.088388346, %v954_v27  ;;  %v1289_v30 = vcombine.high %v997_v28, %v4166_v19  ;;  %v1296_v31 = vrot.slane %v997_v28, %v4754_v25  ;;  %v956_v32 = vpop.f32.mrb[1].mxu0  ;;  %v999_v33 = vpop.f32.mrb[1].mxu1 }
 0x340   : > { %v1050_v35 = vmul.f32 0.088388346, %v956_v32  ;;  %v1304_v36 = vcombine.high %v999_v33, %v4166_v19  ;;  %v1311_v37 = vrot.slane %v999_v33, %v4754_v25  ;;  %v958_v39 = vpop.f32.mrb[2].mxu0  ;;  %v1001_v40 = vpop.f32.mrb[2].mxu1 }
 0x341   : > { %v1053_v41 = vcombine.high %v1049_v29, %v4166_v19  ;;  %v1060_v42 = vrot.slane %v1049_v29, %v4754_v25  ;;  %v1303_v43 = vrot.slane %v1289_v30, %v4754_v25  ;;  %v1051_v44 = vmul.f32 0.088388346, %v958_v39  ;;  %v960_v45 = vpop.f32.mrb[3].mxu0  ;;  %v1003_v46 = vpop.f32.mrb[3].mxu1 }
 0x342   : > { %v1068_v47 = vcombine.high %v1050_v35, %v4166_v19  ;;  %v1075_v48 = vrot.slane %v1050_v35, %v4754_v25  ;;  %v1318_v49 = vrot.slane %v1304_v36, %v4754_v25  ;;  %v1319_v50 = vcombine.low %v1296_v31, %v1311_v37 }
 0x343   : > { %v1067_v51 = vrot.slane %v1053_v41, %v4754_v25  ;;  %v1320_v52 = vcombine.high %v1296_v31, %v1311_v37  ;;  %v1119_v56 = vcombine.high %v1051_v44, %v4166_v19  ;;  %v1126_v57 = vrot.slane %v1051_v44, %v4754_v25 }
 0x344   : > { %v1082_v58 = vrot.slane %v1068_v47, %v4754_v25  ;;  %v1083_v60 = vcombine.low %v1060_v42, %v1075_v48  ;;  %v1084_v61 = vcombine.high %v1060_v42, %v1075_v48  ;;  %v1327_v62 = vrot.slane %v1319_v50, %v4759_v34 }
 0x345   : > { %v1334_v63 = vrot.slane %v1320_v52, %v4759_v34  ;;  %v1335_v0 = vcombine.low %v1303_v43, %v1318_v49  ;;  %v1336_v1 = vcombine.high %v1303_v43, %v1318_v49  ;;  %v1133_v2 = vrot.slane %v1119_v56, %v4754_v25 }
 0x346   : > { %v1091_v3 = vrot.slane %v1083_v60, %v4759_v34  ;;  %v1098_v4 = vrot.slane %v1084_v61, %v4759_v34  ;;  %v1099_v5 = vcombine.low %v1067_v51, %v1082_v58  ;;  %v1100_v6 = vcombine.high %v1067_v51, %v1082_v58 }
 0x347   : > { %v1343_v7 = vrot.slane %v1335_v0, %v4759_v34  ;;  %v1350_v8 = vrot.slane %v1336_v1, %v4759_v34  ;;  %v1421_v9 = vcombine.low %v1327_v62, %v1334_v63  ;;  %v3302_v10 = vcombine.high %v1327_v62, %v1334_v63 }
 0x348   : > { %v1107_v11 = vrot.slane %v1099_v5, %v4759_v34  ;;  %v1114_v12 = vrot.slane %v1100_v6, %v4759_v34  ;;  %v1185_v13 = vcombine.low %v1091_v3, %v1098_v4  ;;  %v3298_v14 = vcombine.high %v1091_v3, %v1098_v4 }
 0x349   : > { %v1428_v15 = vrot.slane %v1421_v9, %v4754_v25  ;;  %v1436_v16 = vrot.slane %v3302_v10, %v4754_v25  ;;  %v1437_v17 = vcombine.low %v1343_v7, %v1350_v8  ;;  %v3303_v18 = vcombine.high %v1343_v7, %v1350_v8 }
 0x34a   : > { %v1192_v20 = vrot.slane %v1185_v13, %v4754_v25  ;;  %v1200_v21 = vrot.slane %v3298_v14, %v4754_v25  ;;  %v1201_v22 = vcombine.low %v1107_v11, %v1114_v12  ;;  %v3299_v23 = vcombine.high %v1107_v11, %v1114_v12 }
 0x34b   : > { %v1444_v24 = vrot.slane %v1437_v17, %v4754_v25  ;;  %v1452_v26 = vrot.slane %v3303_v18, %v4754_v25  ;;  %v1453_v27 = vcombine.low %v1428_v15, %v1436_v16  ;;  %v1355_v28 = vcombine.high %v1001_v40, %v4166_v19 }
 0x34c   : > { %v1208_v29 = vrot.slane %v1201_v22, %v4754_v25  ;;  %v1216_v30 = vrot.slane %v3299_v23, %v4754_v25  ;;  %v1362_v31 = vrot.slane %v1001_v40, %v4754_v25  ;;  %v1052_v32 = vmul.f32 0.088388346, %v960_v45 }
 0x34d   : > { %v1369_v33 = vrot.slane %v1355_v28, %v4754_v25  ;;  %v1370_v35 = vcombine.high %v1003_v46, %v4166_v19  ;;  %v1377_v36 = vrot.slane %v1003_v46, %v4754_v25  ;;  %v1460_v37 = vrot.slane %v1453_v27, %v4759_v34 }
 0x34e   : > { %v1134_v39 = vcombine.high %v1052_v32, %v4166_v19  ;;  %v1141_v41 = vrot.slane %v1052_v32, %v4754_v25  ;;  %v1461_v42 = vcombine.low %v1444_v24, %v1452_v26  ;;  %v1217_v43 = vcombine.low %v1192_v20, %v1200_v21 }
 0x34f   : > { %v1384_v44 = vrot.slane %v1370_v35, %v4754_v25  ;;  %v1385_v47 = vcombine.low %v1362_v31, %v1377_v36  ;;  %v1386_v48 = vcombine.high %v1362_v31, %v1377_v36  ;;  %v1225_v40 = vcombine.low %v1208_v29, %v1216_v30 }
 0x350   : > { %v1148_v45 = vrot.slane %v1134_v39, %v4754_v25  ;;  %v1149_v49 = vcombine.low %v1126_v57, %v1141_v41  ;;  %v1150_v50 = vcombine.high %v1126_v57, %v1141_v41  ;;  %v1468_v51 = vrot.slane %v1461_v42, %v4759_v34 }
 0x351   : > { %v1393_v46 = vrot.slane %v1385_v47, %v4759_v34  ;;  %v1400_v52 = vrot.slane %v1386_v48, %v4759_v34  ;;  %v1401_v56 = vcombine.low %v1369_v33, %v1384_v44  ;;  %v1402_v58 = vcombine.high %v1369_v33, %v1384_v44 }
 0x352   : > { %v1157_v60 = vrot.slane %v1149_v49, %v4759_v34  ;;  %v1164_v61 = vrot.slane %v1150_v50, %v4759_v34  ;;  %v1165_v62 = vcombine.low %v1133_v2, %v1148_v45  ;;  %v1166_v63 = vcombine.high %v1133_v2, %v1148_v45 }
 0x353   : > { %v1409_v0 = vrot.slane %v1401_v56, %v4759_v34  ;;  %v1416_v1 = vrot.slane %v1402_v58, %v4759_v34  ;;  %v1471_v3 = vcombine.low %v1393_v46, %v1400_v52  ;;  %v3304_v57 = vcombine.high %v1393_v46, %v1400_v52 }
 0x354   : > { %v1173_v4 = vrot.slane %v1165_v62, %v4759_v34  ;;  %v1180_v5 = vrot.slane %v1166_v63, %v4759_v34  ;;  %v1235_v6 = vcombine.low %v1157_v60, %v1164_v61  ;;  %v3300_v7 = vcombine.high %v1157_v60, %v1164_v61 }
 0x355   : > { %v1478_v8 = vrot.slane %v1471_v3, %v4754_v25  ;;  %v1486_v9 = vrot.slane %v3304_v57, %v4754_v25  ;;  %v1487_v10 = vcombine.low %v1409_v0, %v1416_v1  ;;  %v3305_v11 = vcombine.high %v1409_v0, %v1416_v1 }
 0x356   : > { %v1242_v2 = vrot.slane %v1235_v6, %v4754_v25  ;;  %v1250_v12 = vrot.slane %v3300_v7, %v4754_v25  ;;  %v1251_v13 = vcombine.low %v1173_v4, %v1180_v5  ;;  %v3301_v14 = vcombine.high %v1173_v4, %v1180_v5 }
 0x357   : > { %v1494_v15 = vrot.slane %v1487_v10, %v4754_v25  ;;  %v1502_v16 = vrot.slane %v3305_v11, %v4754_v25  ;;  %v1503_v17 = vcombine.low %v1478_v8, %v1486_v9  ;;  %v1469_v18 = vcombine.low %v1460_v37, %v1468_v51 }
 0x358   : > { %v1258_v20 = vrot.slane %v1251_v13, %v4754_v25  ;;  %v1266_v21 = vrot.slane %v3301_v14, %v4754_v25  ;;  %v1224_v22 = vrot.slane %v1217_v43, %v4759_v34  ;;  %v1232_v23 = vrot.slane %v1225_v40, %v4759_v34 }
 0x359   : > { %v1521_v24 = vpack.c.bf16 %v1469_v18, %v1469_v18  ;;  %v1470_v26 = vcombine.high %v1460_v37, %v1468_v51  ;;  %v1511_v27 = vcombine.low %v1494_v15, %v1502_v16  ;;  %v1267_v30 = vcombine.low %v1242_v2, %v1250_v12 }
 0x35a   : > { %v1233_v28 = vcombine.low %v1224_v22, %v1232_v23  ;;  %v4819_v29 = vcombine.high %v1224_v22, %v1232_v23  ;;  %v1275_v31 = vcombine.low %v1258_v20, %v1266_v21  ;;  %v1510_v32 = vrot.slane %v1503_v17, %v4759_v34 }
 0x35b   : > { %3440 = vmatpush3.bf16.xpose.msra.mxu1 %v1521_v24  ;;  %v1518_v33 = vrot.slane %v1511_v27, %v4759_v34  ;;  %v1274_v35 = vrot.slane %v1267_v30, %v4759_v34  ;;  %v1522_v51 = vpack.c.bf16 %v1470_v26, %v1470_v26 }
 0x35c   : > { %3445 = vmatprep.subr.bf16.mxu1 %v4166_v19  ;;  %v1282_v36 = vrot.slane %v1275_v31, %v4759_v34  ;;  %v1285_v40 = vpack.c.bf16 %v1233_v28, %v1233_v28  ;;  %v1286_v3 = vpack.c.bf16 %v4819_v29, %v4819_v29 }
 0x35d   : > { %v1519_v39 = vcombine.low %v1510_v32, %v1518_v33  ;;  %v4826_v41 = vcombine.high %v1510_v32, %v1518_v33 }
 0x35e   : > { %v1040_v37 = vpop.f32.mrb[4].mxu0  ;;  %v4828_v42 = vcombine.low %v1274_v35, %v1282_v36  ;;  %v4830_v43 = vcombine.high %v1274_v35, %v1282_v36 }
 0x35f   : > { %v1525_v44 = vcombine.high %v1040_v37, %v4166_v19  ;;  %v1532_v47 = vrot.slane %v1040_v37, %v4754_v25  ;;  %v1042_v48 = vpop.f32.mrb[5].mxu0  ;;  %v1523_v10 = vpack.c.bf16 %v1519_v39, %v1519_v39 }
 0x360   : > { %v1540_v45 = vcombine.high %v1042_v48, %v4166_v19  ;;  %v1547_v49 = vrot.slane %v1042_v48, %v4754_v25  ;;  %v1044_v50 = vpop.f32.mrb[6].mxu0 }
 0x361   : > { %v1539_v46 = vrot.slane %v1525_v44, %v4754_v25  ;;  %v1591_v52 = vcombine.high %v1044_v50, %v4166_v19  ;;  %v1598_v56 = vrot.slane %v1044_v50, %v4754_v25  ;;  %v1046_v58 = vpop.f32.mrb[7].mxu0 }
 0x362   : > { %3442 = vmatmul.mubr.bf16.vlgmr.msra.gmra.mrb[4].mxu1 %v1285_v40  ;;  %v1554_v60 = vrot.slane %v1540_v45, %v4754_v25  ;;  %v1555_v61 = vcombine.low %v1532_v47, %v1547_v49  ;;  %v1556_v62 = vcombine.high %v1532_v47, %v1547_v49  ;;  %v1606_v63 = vcombine.high %v1046_v58, %v4166_v19 }
 0x363   : > { %3446 = vmatpush3.bf16.xpose.msra.mxu1 %v1522_v51  ;;  %v1605_v0 = vrot.slane %v1591_v52, %v4754_v25  ;;  %v1613_v1 = vrot.slane %v1046_v58, %v4754_v25  ;;  %3447 = vmatprep.mubr.msk.bf16.mxu1 %vm4167_vm0, %v4166_v19  ;;  %v1287_v45 = vpack.c.bf16 %v4828_v42, %v4828_v42 }
 0x364   : > { %v1563_v57 = vrot.slane %v1555_v61, %v4759_v34  ;;  %v1570_v4 = vrot.slane %v1556_v62, %v4759_v34  ;;  %v1571_v5 = vcombine.low %v1539_v46, %v1554_v60  ;;  %v1572_v6 = vcombine.high %v1539_v46, %v1554_v60  ;;  %3451 = vmatprep.subr.bf16.mxu1 %v4166_v19 }
 0x365   : > { %v1620_v7 = vrot.slane %v1606_v63, %v4754_v25  ;;  %v1621_v8 = vcombine.low %v1598_v56, %v1613_v1  ;;  %v1622_v9 = vcombine.high %v1598_v56, %v1613_v1  ;;  %v1524_v51 = vpack.c.bf16 %v4826_v41, %v4826_v41 }
 0x366   : > { %v1579_v11 = vrot.slane %v1571_v5, %v4759_v34  ;;  %v1586_v2 = vrot.slane %v1572_v6, %v4759_v34  ;;  %v1657_v12 = vcombine.low %v1563_v57, %v1570_v4  ;;  %v3306_v13 = vcombine.high %v1563_v57, %v1570_v4  ;;  %v3310_v57 = vld [vmem:[%s4629_s28] ss:$0 sm:$0xff] }
 0x367   : > { %v1629_v14 = vrot.slane %v1621_v8, %v4759_v34  ;;  %v1636_v15 = vrot.slane %v1622_v9, %v4759_v34  ;;  %v1637_v16 = vcombine.low %v1605_v0, %v1620_v7  ;;  %v1638_v17 = vcombine.high %v1605_v0, %v1620_v7 }
 0x368   : > { %v1664_v18 = vrot.slane %v1657_v12, %v4754_v25  ;;  %v1672_v20 = vrot.slane %v3306_v13, %v4754_v25  ;;  %v1673_v21 = vcombine.low %v1579_v11, %v1586_v2  ;;  %v3307_v22 = vcombine.high %v1579_v11, %v1586_v2 }
 0x369   : > { %v1645_v23 = vrot.slane %v1637_v16, %v4759_v34  ;;  %v1652_v24 = vrot.slane %v1638_v17, %v4759_v34  ;;  %v1707_v26 = vcombine.low %v1629_v14, %v1636_v15  ;;  %v3308_v27 = vcombine.high %v1629_v14, %v1636_v15  ;;  %v3311_v14 = vld [vmem:[%s4629_s28 + $0x1] ss:$0 sm:$0xff]  ;;  %s3378_s28 = sshll.u32 %s5195_s16, 8 }
 0x36a   : > { %v1680_v28 = vrot.slane %v1673_v21, %v4754_v25  ;;  %v1688_v29 = vrot.slane %v3307_v22, %v4754_v25  ;;  %3448 = vmatmul.mubr.bf16.vlgmr.msra.gmra.mrb[8].mxu1 %v1286_v3  ;;  %v1689_v30 = vcombine.low %v1664_v18, %v1672_v20  ;;  %v1288_v1 = vpack.c.bf16 %v4830_v43, %v4830_v43 }
 0x36b   : > { %v1714_v31 = vrot.slane %v1707_v26, %v4754_v25  ;;  %v1722_v32 = vrot.slane %v3308_v27, %v4754_v25  ;;  %v1723_v33 = vcombine.low %v1645_v23, %v1652_v24  ;;  %v3309_v35 = vcombine.high %v1645_v23, %v1652_v24  ;;  %3452 = vmatpush3.bf16.xpose.msra.mxu1 %v1523_v10 }
 0x36c   : > { %3453 = vmatprep.mubr.msk.bf16.mxu1 %vm4167_vm0, %v4166_v19  ;;  %3457 = vmatprep.subr.bf16.mxu1 %v4166_v19  ;;  %v1697_v36 = vcombine.low %v1680_v28, %v1688_v29  ;;  %v1696_v47 = vrot.slane %v1689_v30, %v4759_v34 }
 0x36d   : > { %v1730_v39 = vrot.slane %v1723_v33, %v4754_v25  ;;  %v1738_v37 = vrot.slane %v3309_v35, %v4754_v25  ;;  %v1739_v44 = vcombine.low %v1714_v31, %v1722_v32 }
 0x36e   : > { %v1704_v48 = vrot.slane %v1697_v36, %v4759_v34 }
 0x36f   : > { %v1747_v40 = vcombine.low %v1730_v39, %v1738_v37  ;;  %v1746_v46 = vrot.slane %v1739_v44, %v4759_v34 }
 0x370   : > { %v1705_v49 = vcombine.low %v1696_v47, %v1704_v48  ;;  %v1706_v50 = vcombine.high %v1696_v47, %v1704_v48 }
 0x371   : > { %v1754_v52 = vrot.slane %v1747_v40, %v4759_v34 }
 0x372   : > { %3454 = vmatmul.mubr.bf16.vlgmr.msra.gmra.mrb[12].mxu1 %v1287_v45  ;;  %v1758_v56 = vpack.c.bf16 %v1706_v50, %v1706_v50  ;;  %v1757_v42 = vpack.c.bf16 %v1705_v49, %v1705_v49 }
 0x373   : > { %3458 = vmatpush3.bf16.xpose.msra.mxu1 %v1524_v51  ;;  %3459 = vmatprep.mubr.msk.bf16.mxu1 %vm4167_vm0, %v4166_v19  ;;  %v1755_v58 = vcombine.low %v1746_v46, %v1754_v52  ;;  %v1756_v60 = vcombine.high %v1746_v46, %v1754_v52 }
 0x374   : > { %3463 = vmatprep.subr.bf16.mxu1 %v4166_v19  ;;  %v4880_v61 = vsel %vm1987_vm1, %v1758_v56, 0  ;;  %v1989_v3 = vsel %vm1987_vm1, %v1757_v42, 0 }
 0x375   : > { %v1759_v41 = vpack.c.bf16 %v1755_v58, %v1755_v58  ;;  %v1760_v62 = vpack.c.bf16 %v1756_v60, %v1756_v60 }
 0x377   : > { %v4883_v63 = vsel %vm1987_vm1, %v1759_v41, 0  ;;  %v4886_v0 = vsel %vm1987_vm1, %v1760_v62, 0 }
 0x37a   : > { %3460 = vmatmul.mubr.bf16.vlgmr.msra.gmra.mrb[16].mxu1 %v1288_v1 }
 0x37b   : > { %3464 = vmatpush3.bf16.msra.mxu1 %v1989_v3  ;;  %3465 = vmatprep.mubr.msk.bf16.mxu1 %vm4167_vm0, %v4166_v19 }
 0x37c   : > { %3469 = vmatprep.subr.bf16.mxu1 %v4166_v19 }
 0x435   : > { %v1809_v4 = vpop.f32.mrb[4].mxu1 }
 0x436   : > { %v1810_v5 = vadd.f32 %v3310_v57, %v1809_v4  ;;  %v3443_v6 = vpop.f32.mrb[5].mxu1 }
 0x437   : > { %v1812_v7 = vpop.f32.mrb[6].mxu1 }
 0x438   : > { %v3444_v8 = vpop.f32.mrb[7].mxu1  ;;  %v1936_v9 = vsel %vm1935_vm2, %v1810_v5, -inf }
 0x439   : > { %1937 = vmax.xlane.f32.xlu0 %v1936_v9 }
 0x43d   : > { %v1849_v43 = vpop.f32.mrb[8].mxu1 }
 0x43e   : > { %v1850_v10 = vadd.f32 %v3310_v57, %v1849_v43  ;;  %v3449_v11 = vpop.f32.mrb[9].mxu1  ;;  %v3709_v43 = vld [vmem:[%s4648_s1 + $0x40] sm:$0xff]  }
 0x43f   : > { %v1852_v2 = vpop.f32.mrb[10].mxu1  ;;  %3395 = vmatprep.subr.bf16.mxu0 %v3709_v43  ;;  %v3712_v11 = vld [vmem:[%s4648_s1 + $0x8] sm:$0xff]  }
 0x440   : > { %v3450_v12 = vpop.f32.mrb[11].mxu1  ;;  %v1939_v13 = vsel %vm1935_vm2, %v1850_v10, -inf  ;;  %v3713_v2 = vld [vmem:[%s4648_s1 + $0x50] sm:$0xff]  }
 0x441   : > { %1940 = vmax.xlane.f32.xlu1 %v1939_v13  ;;  %v3714_v12 = vld [vmem:[%s4648_s1 + $0x10] sm:$0xff]   ;;  %v3716_v13 = vld [vmem:[%s4648_s1 + $0x18] sm:$0xff]  }
 0x445   : > { %v1889_v15 = vpop.f32.mrb[12].mxu1 }
 0x446   : > { %v1890_v16 = vadd.f32 %v3311_v14, %v1889_v15  ;;  %v3455_v17 = vpop.f32.mrb[13].mxu1  ;;  %v3718_v15 = vld [vmem:[%s4648_s1 + $0x20] sm:$0xff]  }
 0x447   : > { %v1892_v18 = vpop.f32.mrb[14].mxu1  ;;  %v3720_v17 = vld [vmem:[%s4648_s1 + $0x28] sm:$0xff]  }
 0x448   : > { %v3456_v20 = vpop.f32.mrb[15].mxu1  ;;  %v1942_v21 = vsel %vm1935_vm2, %v1890_v16, -inf  ;;  %v3721_v18 = vld [vmem:[%s4648_s1 + $0x70] sm:$0xff]  }
 0x449   : > { %1943 = vmax.xlane.f32.xlu0 %v1942_v21  ;;  %v3722_v20 = vld [vmem:[%s4648_s1 + $0x30] sm:$0xff]   ;;  %v3723_v21 = vld [vmem:[%s4648_s1 + $0x78] sm:$0xff]  }
 0x44d   : > { %v1929_v22 = vpop.f32.mrb[16].mxu1 }
 0x44e   : > { %v1930_v23 = vadd.f32 %v3311_v14, %v1929_v22  ;;  %v3461_v24 = vpop.f32.mrb[17].mxu1  ;;  %v3717_v14 = vld [vmem:[%s4648_s1 + $0x60] sm:$0xff]   ;;  %v3724_v22 = vld [vmem:[%s4648_s1 + $0x38] sm:$0xff]  }
 0x44f   : > { %v1932_v26 = vpop.f32.mrb[18].mxu1 }
 0x450   : > { %v3462_v27 = vpop.f32.mrb[19].mxu1  ;;  %v1945_v28 = vsel %vm1935_vm2, %v1930_v23, -inf }
 0x451   : > { %1946 = vmax.xlane.f32.xlu1 %v1945_v28 }
 0x4c6   : > { %v1938_v29 = vpop.xlane.xlu0 %1937 }
 0x4c7   : > { %v1948_v30 = vsub.f32 %v1810_v5, %v1938_v29 }
 0x4c9   : > { %v1952_v31 = vmul.f32 1.442695, %v1948_v30 }
 0x4cb   : > { %3769 = vpow2.f32 %v1952_v31 }
 0x4ce   : > { %v1941_v32 = vpop.xlane.xlu1 %1940 }
 0x4cf   : > { %v1949_v33 = vsub.f32 %v1850_v10, %v1941_v32  ;;  %v3710_v10 = vld [vmem:[%s4648_s1] sm:$0xff]  }
 0x4d0   : > { %3396 = vmatpush3.bf16.msra.mxu0 %v3710_v10 }
 0x4d1   : > { %v1954_v35 = vmul.f32 1.442695, %v1949_v33 }
 0x4d3   : > { %3771 = vpow2.f32 %v1954_v35 }
 0x4d5   : > { %v3770_v36 = vpop.eup %3769 }
 0x4d6   : > { %v1944_v39 = vpop.xlane.xlu0 %1943  ;;  %v1960_v37 = vsel %vm1935_vm2, %v3770_v36, 0.0 }
 0x4d7   : > { %v1950_v44 = vsub.f32 %v1890_v16, %v1944_v39  ;;  %1961 = vadd.xlane.f32.xlu0 %v1960_v37  ;;  %v3719_v16 = vld [vmem:[%s4648_s1 + $0x68] sm:$0xff]  }
 0x4d9   : > { %v1956_v47 = vmul.f32 1.442695, %v1950_v44 }
 0x4db   : > { %3773 = vpow2.f32 %v1956_v47 }
 0x4dd   : > { %v3772_v48 = vpop.eup %3771 }
 0x4de   : > { %v1947_v40 = vpop.xlane.xlu1 %1946  ;;  %v1963_v45 = vsel %vm1935_vm2, %v3772_v48, 0.0 }
 0x4df   : > { %v1951_v49 = vsub.f32 %v1930_v23, %v1947_v40  ;;  %1964 = vadd.xlane.f32.xlu1 %v1963_v45 }
 0x4e1   : > { %v1958_v50 = vmul.f32 1.442695, %v1951_v49 }
 0x4e3   : > { %3775 = vpow2.f32 %v1958_v50 }
 0x4e5   : > { %v3774_v51 = vpop.eup %3773 }
 0x4e6   : > { %v1966_v46 = vsel %vm1935_vm2, %v3774_v51, 0.0 }
 0x4e7   : > { %1967 = vadd.xlane.f32.xlu0 %v1966_v46 }
 0x4ed   : > { %v3776_v52 = vpop.eup %3775 }
 0x4ee   : > { %v1969_v56 = vsel %vm1935_vm2, %v3776_v52, 0.0 }
 0x4ef   : > { %1970 = vadd.xlane.f32.xlu1 %v1969_v56 }
 0x564   : > { %v1962_v58 = vpop.xlane.xlu0 %1961 }
 0x565   : > { %3777 = vrcp.f32 %v1962_v58 }
 0x56c   : > { %v1965_v60 = vpop.xlane.xlu1 %1964 }
 0x56d   : > { %3779 = vrcp.f32 %v1965_v60 }
 0x56f   : > { %v3778_v42 = vpop.eup %3777 }
 0x570   : > { %v1976_v41 = vmul.f32 %v3778_v42, %v3770_v36 }
 0x572   : > { %v1980_v62 = vpack.c.bf16 %v1976_v41, %v1976_v41 }
 0x574   : > { %v1968_v1 = vpop.xlane.xlu0 %1967  ;;  %3466 = vmatmul.mubr.msk.bf16.vlgmr.msra.gmra.mrb[20].mxu1 %vm1935_vm2, %v1980_v62 }
 0x575   : > { %3781 = vrcp.f32 %v1968_v1  ;;  %3470 = vmatpush3.bf16.msra.mxu1 %v4880_v61  ;;  %3471 = vmatprep.mubr.msk.bf16.mxu1 %vm4167_vm0, %v4166_v19 }
 0x576   : > { %3475 = vmatprep.subr.bf16.mxu1 %v4166_v19 }
 0x577   : > { %v3780_v3 = vpop.eup %3779 }
 0x578   : > { %v1977_v57 = vmul.f32 %v3780_v3, %v3772_v48 }
 0x57a   : > { %v1981_v4 = vpack.c.bf16 %v1977_v57, %v1977_v57 }
 0x57c   : > { %v1971_v5 = vpop.xlane.xlu1 %1970  ;;  %3472 = vmatmul.mubr.msk.bf16.vlgmr.msra.gmra.mrb[24].mxu1 %vm1935_vm2, %v1981_v4 }
 0x57d   : > { %3783 = vrcp.f32 %v1971_v5  ;;  %3476 = vmatpush3.bf16.msra.mxu1 %v4883_v63  ;;  %3477 = vmatprep.mubr.msk.bf16.mxu1 %vm4167_vm0, %v4166_v19 }
 0x57e   : > { %3481 = vmatprep.subr.bf16.mxu1 %v4166_v19 }
 0x57f   : > { %v3782_v61 = vpop.eup %3781 }
 0x580   : > { %v1978_v6 = vmul.f32 %v3782_v61, %v3774_v51 }
 0x582   : > { %v1982_v7 = vpack.c.bf16 %v1978_v6, %v1978_v6 }
 0x584   : > { %3478 = vmatmul.mubr.msk.bf16.vlgmr.msra.gmra.mrb[28].mxu1 %vm1935_vm2, %v1982_v7 }
 0x585   : > { %3482 = vmatpush3.bf16.msra.mxu1 %v4886_v0  ;;  %3483 = vmatprep.mubr.msk.bf16.mxu1 %vm4167_vm0, %v4166_v19  ;;  %v3711_v0 = vld [vmem:[%s4648_s1 + $0x48] sm:$0xff]  }
 0x586   : > { %3397 = vmatprep.subr.bf16.mxu0 %v3711_v0 }
 0x587   : > { %v3784_v63 = vpop.eup %3783  ;;  %3398 = vmatpush3.bf16.msra.mxu0 %v3712_v11 }
 0x588   : > { %v1979_v8 = vmul.f32 %v3784_v63, %v3776_v52  ;;  %3399 = vmatprep.subr.bf16.mxu0 %v3713_v2 }
 0x58a   : > { %v1983_v9 = vpack.c.bf16 %v1979_v8, %v1979_v8 }
 0x58b   : > { %3400 = vmatpush3.bf16.msra.mxu0 %v3714_v12 }
 0x58c   : > { %3484 = vmatmul.mubr.msk.bf16.vlgmr.msra.gmra.mrb[32].mxu1 %vm1935_vm2, %v1983_v9 }
 0x58d   : > { %2753 = vmatprep.mubr.bf16.mxu1 %v4165_v38  ;;  %v3715_v38 = vld [vmem:[%s4648_s1 + $0x58] sm:$0xff]   ;;  %s4014_s1 = sshll.u32 %s4170_s30, 4  ;;  %s4015_s1 = int_to_ptr.vmem [resolvable:$false] %s4014_s1 }
 0x58e   : > { %3401 = vmatprep.subr.bf16.mxu0 %v3715_v38  ;;  %s4016_s3 = scalar_lea.vmem %s4015_s1, 512  ;;  %p4017_p8 = scmp.lt.s32.totalorder %s5034_s5, %s4015_s1 }
 0x58f   : > { %3402 = vmatpush3.bf16.msra.mxu0 %v3716_v13  ;;  %p4018_p2 = scmp.lt.s32.totalorder %s4016_s3, %s4010_s23 }
 0x590   : > { %3403 = vmatprep.subr.bf16.mxu0 %v3717_v14 }
 0x591   : > { %p4019_p10 = por %p4018_p2, %p4017_p8 }
 0x593   : > { %3404 = vmatpush3.bf16.msra.mxu0 %v3718_v15  ;;  %p4020_p5 = pnand %p4019_p10, %p4013_p9 }
 0x594   : > { %3405 = vmatprep.subr.bf16.mxu0 %v3719_v16 }
 0x597   : > { %3406 = vmatpush3.bf16.msra.mxu0 %v3720_v17 }
 0x598   : > { %3407 = vmatprep.subr.bf16.mxu0 %v3721_v18 }
 0x59b   : > { %3408 = vmatpush3.bf16.msra.mxu0 %v3722_v20 }
 0x59c   : > { %3409 = vmatprep.subr.bf16.mxu0 %v3723_v21 }
 0x59f   : > { %3410 = vmatpush3.bf16.msra.mxu0 %v3724_v22 }
 0x647   : > { %v2025_v23 = vpop.f32.mrb[20].mxu1 }
 0x648   : > { %v3467_v24 = vpop.f32.mrb[21].mxu1  ;;  %v2169_v28 = vcombine.high %v2025_v23, %v4166_v19  ;;  %v2176_v30 = vrot.slane %v2025_v23, %v4754_v25 }
 0x649   : > { %v2028_v26 = vpop.f32.mrb[22].mxu1 }
 0x64a   : > { %v3468_v27 = vpop.f32.mrb[23].mxu1  ;;  %v2183_v36 = vrot.slane %v2169_v28, %v4754_v25 }
 0x64f   : > { %v2071_v29 = vpop.f32.mrb[24].mxu1 }
 0x650   : > { %v2184_v31 = vcombine.high %v2071_v29, %v4166_v19  ;;  %v2191_v32 = vrot.slane %v2071_v29, %v4754_v25  ;;  %v3473_v33 = vpop.f32.mrb[25].mxu1 }
 0x651   : > { %v2074_v35 = vpop.f32.mrb[26].mxu1 }
 0x652   : > { %v2198_v39 = vrot.slane %v2184_v31, %v4754_v25  ;;  %v2199_v37 = vcombine.low %v2176_v30, %v2191_v32  ;;  %v2200_v44 = vcombine.high %v2176_v30, %v2191_v32  ;;  %v3474_v47 = vpop.f32.mrb[27].mxu1 }
 0x654   : > { %v2207_v48 = vrot.slane %v2199_v37, %v4759_v34  ;;  %v2214_v40 = vrot.slane %v2200_v44, %v4759_v34  ;;  %v2215_v45 = vcombine.low %v2183_v36, %v2198_v39  ;;  %v2216_v49 = vcombine.high %v2183_v36, %v2198_v39 }
 0x656   : > { %v2223_v50 = vrot.slane %v2215_v45, %v4759_v34  ;;  %v2230_v51 = vrot.slane %v2216_v49, %v4759_v34  ;;  %v2301_v46 = vcombine.low %v2207_v48, %v2214_v40  ;;  %v3316_v52 = vcombine.high %v2207_v48, %v2214_v40 }
 0x657   : > { %v2117_v56 = vpop.f32.mrb[28].mxu1  ;;  %v2437_v48 = vsub.s32 4, %v4719_v53 }
 0x658   : > { %v2308_v58 = vrot.slane %v2301_v46, %v4754_v25  ;;  %v2316_v60 = vrot.slane %v3316_v52, %v4754_v25  ;;  %v2317_v42 = vcombine.low %v2223_v50, %v2230_v51  ;;  %v3317_v41 = vcombine.high %v2223_v50, %v2230_v51  ;;  %v3479_v62 = vpop.f32.mrb[29].mxu1 }
 0x659   : > { %v2120_v1 = vpop.f32.mrb[30].mxu1  ;;  %v2235_v6 = vcombine.high %v2117_v56, %v4166_v19  ;;  %v2242_v8 = vrot.slane %v2117_v56, %v4754_v25  ;;  %v3797_v56 = vld [vmem:[%s4667_s19] sm:$0xff] }
 0x65a   : > { %v2324_v3 = vrot.slane %v2317_v42, %v4754_v25  ;;  %v2332_v57 = vrot.slane %v3317_v41, %v4754_v25  ;;  %v3480_v4 = vpop.f32.mrb[31].mxu1  ;;  %v2333_v5 = vcombine.low %v2308_v58, %v2316_v60  ;;  %v3798_v60 = vld [vmem:[%s4667_s19 + $0x8] sm:$0xff] }
 0x65b   : > { %v2249_v38 = vrot.slane %v2235_v6, %v4754_v25  ;;  %v3727_v41 = vld [vmem:[%s4650_s21 + $0x4] ss:$8 sps:$4 sm:$0xff]   ;;  %v3730_v62 = vld [vmem:[%s4650_s21 + $0x14] ss:$8 sps:$4 sm:$0xff]   ;;  %v3728_v1 = vld [vmem:[%s4650_s21 + $0x10] ss:$8 sps:$4 sm:$0xff]  }
 0x65c   : > { %v2341_v61 = vcombine.low %v2324_v3, %v2332_v57  ;;  %v2340_v7 = vrot.slane %v2333_v5, %v4759_v34  ;;  %2721 = vmatprep.subr.bf16.mxu1 %v3727_v41  ;;  %v2629_v41 = vld [vmem:[%s4661_s18] sm:$0x3] }
 0x65e   : > { %v2348_v63 = vrot.slane %v2341_v61, %v4759_v34 }
 0x65f   : > { %v2163_v9 = vpop.f32.mrb[32].mxu1 }
 0x660   : > { %v2250_v43 = vcombine.high %v2163_v9, %v4166_v19  ;;  %v2257_v10 = vrot.slane %v2163_v9, %v4754_v25  ;;  %v3485_v0 = vpop.f32.mrb[33].mxu1  ;;  %v2350_v11 = vcombine.high %v2340_v7, %v2348_v63  ;;  %v2349_v2 = vcombine.low %v2340_v7, %v2348_v63  ;;  %v3731_v9 = vld [vmem:[%s4650_s21 + $0x20] ss:$8 sps:$4 sm:$0xff]  }
 0x661   : > { %v2166_v12 = vpop.f32.mrb[34].mxu1  ;;  %v3739_v0 = vld [vmem:[%s4650_s21 + $0x44] ss:$8 sps:$4 sm:$0xff]  }
 0x662   : > { %v2264_v13 = vrot.slane %v2250_v43, %v4754_v25  ;;  %v2265_v14 = vcombine.low %v2242_v8, %v2257_v10  ;;  %v2266_v15 = vcombine.high %v2242_v8, %v2257_v10  ;;  %v3486_v16 = vpop.f32.mrb[35].mxu1  ;;  %v3733_v8 = vld [vmem:[%s4650_s21 + $0x24] ss:$8 sps:$4 sm:$0xff]   ;;  %v3736_v43 = vld [vmem:[%s4650_s21 + $0x34] ss:$8 sps:$4 sm:$0xff]  }
 0x663   : > { %v3734_v10 = vld [vmem:[%s4650_s21 + $0x30] ss:$8 sps:$4 sm:$0xff]  }
 0x664   : > { %v2273_v17 = vrot.slane %v2265_v14, %v4759_v34  ;;  %v2280_v18 = vrot.slane %v2266_v15, %v4759_v34  ;;  %v2281_v20 = vcombine.low %v2249_v38, %v2264_v13  ;;  %v2282_v21 = vcombine.high %v2249_v38, %v2264_v13  ;;  %v3740_v12 = vld [vmem:[%s4650_s21 + $0x50] ss:$8 sps:$4 sm:$0xff]   ;;  %v3745_v38 = vld [vmem:[%s4650_s21 + $0x64] ss:$8 sps:$4 sm:$0xff]   ;;  %v3743_v13 = vld [vmem:[%s4650_s21 + $0x60] ss:$8 sps:$4 sm:$0xff]  }
 0x665   : > { %v3748_v14 = vld [vmem:[%s4650_s21 + $0x74] ss:$8 sps:$4 sm:$0xff]   ;;  %v3746_v15 = vld [vmem:[%s4650_s21 + $0x70] ss:$8 sps:$4 sm:$0xff]  }
 0x666   : > { %v2289_v19 = vrot.slane %v2281_v20, %v4759_v34  ;;  %v2296_v22 = vrot.slane %v2282_v21, %v4759_v34  ;;  %v2351_v23 = vcombine.low %v2273_v17, %v2280_v18  ;;  %v3318_v24 = vcombine.high %v2273_v17, %v2280_v18 }
 0x668   : > { %v2358_v26 = vrot.slane %v2351_v23, %v4754_v25  ;;  %v2366_v27 = vrot.slane %v3318_v24, %v4754_v25  ;;  %v2367_v28 = vcombine.low %v2289_v19, %v2296_v22  ;;  %v3319_v29 = vcombine.high %v2289_v19, %v2296_v22  ;;  %v4998_v23 = vld [vmem:[%s4636_s17] sm:$0xff]  ;;  %s5197_s17 = sld [smem:[#allocation41_spill]] }
 0x669   : > { %v2602_v22 = vsub.s32 2, %v4719_v53 }
 0x66a   : > { %v2374_v30 = vrot.slane %v2367_v28, %v4754_v25  ;;  %v2382_v31 = vrot.slane %v3319_v29, %v4754_v25  ;;  %v2383_v32 = vcombine.low %v2358_v26, %v2366_v27  ;;  %v2438_v25 = vrot.slane %v4723_v55, %v2437_v48  ;;  %v3725_v55 = vld [vmem:[%s4650_s21] ss:$8 sps:$4 sm:$0xff]  }
 0x66b   : > { %2722 = vmatpush1.bf16.msra.mxu1 %v3725_v55  ;;  %v2603_v24 = vrot.slane %v4998_v23, %v2602_v22  ;;  %v2608_v26 = vsub.s32 3, %v4719_v53  ;;  %v3752_v48 = vld [vmem:[%s4663_s8 + $0x8] sm:$0xff]   ;;  %v3764_v55 = vld [vmem:[%s4663_s8 + $0x38] sm:$0xff]  }
 0x66c   : > { %v2391_v33 = vcombine.low %v2374_v30, %v2382_v31  ;;  %v2390_v35 = vrot.slane %v2383_v32, %v4759_v34  ;;  %2723 = vmatprep.subr.bf16.mxu1 %v3730_v62  ;;  %v2634_v62 = vrot.slane %v2629_v41, %v621_v54 }
 0x66d   : > { %v2609_v32 = vrot.slane %v4998_v23, %v2608_v26 }
 0x66e   : > { %v2398_v36 = vrot.slane %v2391_v33, %v4759_v34  ;;  %s5032_s20 = scalar_lea.hbm %s5197_s17, %s3378_s28 }
 0x66f   : > { %2724 = vmatpush1.bf16.msra.mxu1 %v3728_v1  ;;  %v2638_v1 = vrot.slane %v2629_v41, %v627_v59 }
 0x670   : > { %v2400_v39 = vcombine.high %v2390_v35, %v2398_v36  ;;  %v2399_v37 = vcombine.low %v2390_v35, %v2398_v36  ;;  %2725 = vmatprep.subr.bf16.mxu1 %v3733_v8 }
 0x672   : > { %v2402_v44 = vpack.c.bf16 %v2400_v39, %v2350_v11  ;;  %v2401_v47 = vpack.c.bf16 %v2399_v37, %v2349_v2  ;;  %v3737_v11 = vld [vmem:[%s4650_s21 + $0x40] ss:$8 sps:$4 sm:$0xff]   ;;  %v3742_v2 = vld [vmem:[%s4650_s21 + $0x54] ss:$8 sps:$4 sm:$0xff]  }
 0x673   : > { %2726 = vmatpush1.bf16.msra.mxu1 %v3731_v9  ;;  %v3749_v37 = vld [vmem:[%s4663_s8 + $0x40] sm:$0xff]  }
 0x674   : > { %2567 = vmatprep.mubr.bf16.mxu0 %v2402_v44  ;;  %2727 = vmatprep.subr.bf16.mxu1 %v3736_v43  ;;  %v3750_v44 = vld [vmem:[%s4663_s8] sm:$0xff]  }
 0x675   : > { %2568 = vmatmul.mubr.bf16.vlgmr.msra.gmra.mrb[8].mxu0 %v2401_v47  ;;  %3417 = vmatprep.subr.bf16.mxu0 %v3749_v37  ;;  %v3751_v47 = vld [vmem:[%s4663_s8 + $0x48] sm:$0xff]  }
 0x676   : > { %3418 = vmatpush3.bf16.msra.mxu0 %v3750_v44 }
 0x677   : > { %2728 = vmatpush1.bf16.msra.mxu1 %v3734_v10  ;;  %3419 = vmatprep.subr.bf16.mxu0 %v3751_v47 }
 0x678   : > { %2729 = vmatprep.subr.bf16.mxu1 %v3739_v0 }
 0x67a   : > { %3420 = vmatpush3.bf16.msra.mxu0 %v3752_v48 }
 0x67b   : > { %2730 = vmatpush1.bf16.msra.mxu1 %v3737_v11 }
 0x67c   : > { %2731 = vmatprep.subr.bf16.mxu1 %v3742_v2 }
 0x67f   : > { %2732 = vmatpush1.bf16.msra.mxu1 %v3740_v12 }
 0x680   : > { %2733 = vmatprep.subr.bf16.mxu1 %v3745_v38 }
 0x683   : > { %2734 = vmatpush1.bf16.msra.mxu1 %v3743_v13 }
 0x684   : > { %2735 = vmatprep.subr.bf16.mxu1 %v3748_v14 }
 0x687   : > { %2736 = vmatpush1.bf16.msra.mxu1 %v3746_v15 }
 0x748   : > { %v3411_v40 = vpop.f32.mrb[8].mxu0 }
 0x749   : > { %v3412_v45 = vpop.f32.mrb[9].mxu0 }
 0x74a   : > { %v3413_v49 = vadd.f32 %v3412_v45, %v3411_v40  ;;  %v3414_v50 = vpop.f32.mrb[10].mxu0  ;;  %v3753_v40 = vld [vmem:[%s4663_s8 + $0x50] sm:$0xff]   ;;  %v3755_v45 = vld [vmem:[%s4663_s8 + $0x58] sm:$0xff]  }
 0x74b   : > { %v3415_v34 = vpop.f32.mrb[11].mxu0  ;;  %3421 = vmatprep.subr.bf16.mxu0 %v3753_v40 }
 0x74c   : > { %v2570_v51 = vadd.f32 %v3413_v49, %v2438_v25  ;;  %v3416_v46 = vadd.f32 %v3415_v34, %v3414_v50  ;;  %v3756_v49 = vld [vmem:[%s4663_s8 + $0x18] sm:$0xff]   ;;  %v3757_v50 = vld [vmem:[%s4663_s8 + $0x60] sm:$0xff]  }
 0x74d   : > { %v3758_v34 = vld [vmem:[%s4663_s8 + $0x20] sm:$0xff]  }
 0x74e   : > { %v2573_v52 = vadd.f32 %v3416_v46, %v2438_v25  ;;  %v4971_v58 = vadd.f32 %v3797_v56, %v2570_v51  ;;  %v3754_v25 = vld [vmem:[%s4663_s8 + $0x10] sm:$0xff]   ;;  %v3759_v51 = vld [vmem:[%s4663_s8 + $0x68] sm:$0xff]  }
 0x74f   : > { %3422 = vmatpush3.bf16.msra.mxu0 %v3754_v25  ;;  %v3760_v46 = vld [vmem:[%s4663_s8 + $0x28] sm:$0xff]   ;;  %v3762_v56 = vld [vmem:[%s4663_s8 + $0x30] sm:$0xff]   ;;  %v2836_v25 = vsub.s32 5, %v4719_v53 }
 0x750   : > { %2578 = vadd.xlane.f32.xlu0 %v4971_v58  ;;  %v4975_v42 = vadd.f32 %v3798_v60, %v2573_v52  ;;  %3423 = vmatprep.subr.bf16.mxu0 %v3755_v45  ;;  %v3761_v52 = vld [vmem:[%s4663_s8 + $0x70] sm:$0xff]   ;;  %v3763_v60 = vld [vmem:[%s4663_s8 + $0x78] sm:$0xff]  }
 0x752   : > { %2580 = vadd.xlane.f32.xlu1 %v4975_v42 }
 0x753   : > { %3424 = vmatpush3.bf16.msra.mxu0 %v3756_v49  ;;  %v2837_v49 = vrot.slane %v4998_v23, %v2836_v25 }
 0x754   : > { %3425 = vmatprep.subr.bf16.mxu0 %v3757_v50 }
 0x757   : > { %3426 = vmatpush3.bf16.msra.mxu0 %v3758_v34 }
 0x758   : > { %3427 = vmatprep.subr.bf16.mxu0 %v3759_v51 }
 0x75b   : > { %3428 = vmatpush3.bf16.msra.mxu0 %v3760_v46 }
 0x75c   : > { %3429 = vmatprep.subr.bf16.mxu0 %v3761_v52 }
 0x75f   : > { %3430 = vmatpush3.bf16.msra.mxu0 %v3762_v56 }
 0x760   : > { %3431 = vmatprep.subr.bf16.mxu0 %v3763_v60 }
 0x763   : > { %3432 = vmatpush3.bf16.msra.mxu0 %v3764_v55 }
 0x7dd   : > { %v2579_v3 = vpop.xlane.xlu0 %2578 }
 0x7de   : > { %v2582_v57 = vmul.f32 0.0078125, %v2579_v3 }
 0x7df   : > { %v2581_v4 = vpop.xlane.xlu1 %2580 }
 0x7e0   : > { %v2584_v5 = vsub.f32 %v4971_v58, %v2582_v57  ;;  %v2583_v61 = vmul.f32 0.0078125, %v2581_v4 }
 0x7e2   : > { %v2585_v6 = vsub.f32 %v4975_v42, %v2583_v61  ;;  %v2586_v7 = vmul.f32 %v2584_v5, %v2584_v5 }
 0x7e4   : > { %2588 = vadd.xlane.f32.xlu0 %v2586_v7  ;;  %v2587_v63 = vmul.f32 %v2585_v6, %v2585_v6 }
 0x7e6   : > { %2590 = vadd.xlane.f32.xlu1 %v2587_v63 }
 0x871   : > { %v2589_v16 = vpop.xlane.xlu0 %2588 }
 0x872   : > { %v2592_v17 = vmul.f32 0.0078125, %v2589_v16 }
 0x873   : > { %v2591_v18 = vpop.xlane.xlu1 %2590 }
 0x874   : > { %v2594_v20 = vadd.f32 1e-05, %v2592_v17  ;;  %v2593_v21 = vmul.f32 0.0078125, %v2591_v18 }
 0x876   : > { %3785 = vrsqrt.f32 %v2594_v20  ;;  %v2595_v19 = vadd.f32 1e-05, %v2593_v21 }
 0x878   : > { %3787 = vrsqrt.f32 %v2595_v19 }
 0x880   : > { %v3786_v27 = vpop.eup %3785 }
 0x881   : > { %v2598_v28 = vmul.f32 %v3786_v27, %v2584_v5 }
 0x882   : > { %v3788_v29 = vpop.eup %3787 }
 0x883   : > { %v2599_v30 = vmul.f32 %v3788_v29, %v2585_v6  ;;  %v2604_v31 = vmul.f32 %v2603_v24, %v2598_v28 }
 0x885   : > { %v2605_v33 = vmul.f32 %v2603_v24, %v2599_v30  ;;  %v2610_v35 = vadd.f32 %v2609_v32, %v2604_v31 }
 0x887   : > { %v2611_v36 = vadd.f32 %v2609_v32, %v2605_v33 }
 0x889   : > { %v2612_v39 = vpack.c.bf16 %v2611_v36, %v2610_v35 }
 0x88b   : > { %2754 = vmatmul.mubr.bf16.vlgmr.msra.gmra.mrb[36].mxu1 %v2612_v39 }
 0x95e   : > { %v2755_v3 = vpop.f32.mrb[36].mxu1 }
 0x95f   : > { %v2756_v57 = vadd.f32 %v2755_v3, %v2634_v62  ;;  %v2757_v4 = vpop.f32.mrb[37].mxu1 }
 0x960   : > { %v2758_v5 = vadd.f32 %v2757_v4, %v2638_v1  ;;  %v2759_v61 = vpop.f32.mrb[38].mxu1 }
 0x961   : > { %v2764_v6 = vmul.f32 %v2756_v57, %v2756_v57  ;;  %v2760_v7 = vadd.f32 %v2759_v61, %v2634_v62  ;;  %v2761_v63 = vpop.f32.mrb[39].mxu1 }
 0x962   : > { %v2765_v8 = vmul.f32 %v2758_v5, %v2758_v5  ;;  %v2762_v9 = vadd.f32 %v2761_v63, %v2638_v1 }
 0x963   : > { %v2768_v43 = vmul.f32 %v2764_v6, %v2756_v57  ;;  %v2766_v10 = vmul.f32 %v2760_v7, %v2760_v7 }
 0x964   : > { %v2769_v0 = vmul.f32 %v2765_v8, %v2758_v5  ;;  %v2767_v11 = vmul.f32 %v2762_v9, %v2762_v9 }
 0x965   : > { %v2772_v2 = vmul.f32 0.044715, %v2768_v43  ;;  %v2770_v12 = vmul.f32 %v2766_v10, %v2760_v7 }
 0x966   : > { %v2773_v54 = vmul.f32 0.044715, %v2769_v0  ;;  %v2771_v38 = vmul.f32 %v2767_v11, %v2762_v9 }
 0x967   : > { %v2776_v13 = vadd.f32 %v2772_v2, %v2756_v57  ;;  %v2774_v59 = vmul.f32 0.044715, %v2770_v12 }
 0x968   : > { %v2777_v14 = vadd.f32 %v2773_v54, %v2758_v5  ;;  %v2775_v15 = vmul.f32 0.044715, %v2771_v38 }
 0x969   : > { %v2780_v16 = vmul.f32 0.7978846, %v2776_v13  ;;  %v2778_v17 = vadd.f32 %v2774_v59, %v2760_v7 }
 0x96a   : > { %v2781_v18 = vmul.f32 0.7978846, %v2777_v14  ;;  %v2779_v20 = vadd.f32 %v2775_v15, %v2762_v9 }
 0x96b   : > { %3789 = vtanh.f32 %v2780_v16  ;;  %v2782_v21 = vmul.f32 0.7978846, %v2778_v17 }
 0x96c   : > { %3791 = vtanh.f32 %v2781_v18  ;;  %v2783_v19 = vmul.f32 0.7978846, %v2779_v20 }
 0x96d   : > { %3793 = vtanh.f32 %v2782_v21 }
 0x96e   : > { %3795 = vtanh.f32 %v2783_v19 }
 0x975   : > { %v3790_v22 = vpop.eup %3789 }
 0x976   : > { %v3792_v24 = vpop.eup %3791  ;;  %v2788_v26 = vadd.f32 1.0, %v3790_v22 }
 0x977   : > { %v3794_v27 = vpop.eup %3793  ;;  %v2789_v28 = vadd.f32 1.0, %v3792_v24 }
 0x978   : > { %v3796_v29 = vpop.eup %3795  ;;  %v2792_v30 = vmul.f32 0.5, %v2788_v26  ;;  %v2790_v31 = vadd.f32 1.0, %v3794_v27 }
 0x979   : > { %v2791_v32 = vadd.f32 1.0, %v3796_v29  ;;  %v2793_v33 = vmul.f32 0.5, %v2789_v28 }
 0x97a   : > { %v2794_v35 = vmul.f32 0.5, %v2790_v31  ;;  %v2796_v39 = vmul.f32 %v2792_v30, %v2756_v57 }
 0x97b   : > { %v2795_v36 = vmul.f32 0.5, %v2791_v32  ;;  %v2797_v44 = vmul.f32 %v2793_v33, %v2758_v5 }
 0x97c   : > { %v2798_v37 = vmul.f32 %v2794_v35, %v2760_v7 }
 0x97d   : > { %v2799_v47 = vmul.f32 %v2795_v36, %v2762_v9 }
 0x97e   : > { %v2800_v48 = vpack.c.bf16 %v2798_v37, %v2796_v39 }
 0x97f   : > { %v2801_v40 = vpack.c.bf16 %v2799_v47, %v2797_v44 }
 0x981   : > { %2966 = vmatprep.mubr.bf16.mxu0 %v2801_v40 }
 0x982   : > { %2967 = vmatmul.mubr.bf16.vlgmr.msra.gmra.mrb[12].mxu0 %v2800_v48 }
 0xa55   : > { %v3433_v45 = vpop.f32.mrb[12].mxu0 }
 0xa56   : > { %v3434_v50 = vpop.f32.mrb[13].mxu0 }
 0xa57   : > { %v3435_v34 = vadd.f32 %v3434_v50, %v3433_v45  ;;  %v3436_v51 = vpop.f32.mrb[14].mxu0 }
 0xa58   : > { %v3437_v46 = vpop.f32.mrb[15].mxu0 }
 0xa59   : > { %v2969_v52 = vadd.f32 %v3435_v34, %v2837_v49  ;;  %v3438_v56 = vadd.f32 %v3437_v46, %v3436_v51 }
 0xa5b   : > { %v2975_v60 = vadd.f32 %v2969_v52, %v4971_v58  ;;  %v2972_v55 = vadd.f32 %v3438_v56, %v2837_v49 }
 0xa5d   : > { %2977 = vst [vmem:[%s4667_s19] sm:$0xff] %v2975_v60  ;;  %v2976_v53 = vadd.f32 %v2972_v55, %v4975_v42 }
 0xa5f   : > { %2978 = vst [vmem:[%s4667_s19 + $0x8] sm:$0xff] %v2976_v53 }
 0xa60   : > { %4023 = shalt.err (!%p4020_p5)
}
 0xa61   : > { %s4024_s21 = scalar_lea.hbm %s5032_s20, 256  ;;  %s4028_s22 = scalar_lea.hbm %s5197_s17, 512 }
 0xa62   : > { %p4025_p7 = scmp.ne.s32.totalorder %s5032_s20, %s4024_s21  ;;  %p4029_p11 = scmp.lt.u32.totalorder %s5032_s20, %s5197_s17 }
 0xa63   : > { %p4030_p0 = scmp.lt.u32.totalorder %s4028_s22, %s4024_s21  ;;  %p4032_p3 = scmp.lt.u32.totalorder %s4024_s21, %s5032_s20 }
 0xa64   : > { %p4026_p4 = pnand %p4025_p7, %p5198_p6 }
 0xa65   : > { %p4031_p12 = por %p4030_p0, %p4029_p11 }
 0xa66   : > { %p4027_p13 = pneg %p4026_p4 }
 0xa67   : > { %p4033_p1 = por %p4032_p3, %p4031_p12 }
 0xa69   : > { %p4034_p9 = pnand %p4033_p1, %p4027_p13 }
 0xa6b   : > { %4037 = shalt.err (!%p4034_p9)
}
 0xa6c   : > { %s4171_s6 = smov 128   ;;  %s4172_s18 = smov 8  }
 0xa6d   : > { %3504 = dma.vmem_to_hbm [thread:$0]  (%p5198_p6), %s5034_s5, 256, %s5032_s20, %s2980_s15, %s4171_s6, %s4171_s6, %s4172_s18  }
 0xa6e PF: > { %s5199_s8 = sld [smem:[#allocation27_spill]]  ;;  %s5200_s19 = sld [smem:[#allocation23_spill]] }
 0xa6f   : > { %s5201_s16 = sld [smem:[#allocation31_spill]] }
 0xa74   : > { %p3533_p8 = scmp.ge.s32.totalorder %s5199_s8, 2  ;;  %s3008_s28 = sand.u32 1, %s5200_s19  }
 0xa75   : > { %p5202_p2 = scmp.ne.s32.totalorder %s5201_s16, 0  ;;  %s3009_s25 = scalar_lea.sflag [#allocation4], %s3008_s28 }
 0xa77   : > { %p3529_p10 = pnand %p3533_p8, %p5202_p2 }
 0xa79   : > { %4103 = dma.done.wait (!%p3529_p10), %s3009_s25, 256  }
 0xa7a   : > { %4105 = vsyncadd (!%p3529_p10), %s3009_s25, 4294967040  ;;  %s33_s15 = sadd.s32 1, %s5199_s8   ;;  %s5203_s27 = sld [smem:[#allocation21_spill]] }
 0xa7b   : > { %p30_p5 = scmp.ge.s32.totalorder %s33_s15, 6   ;;  %s5204_s28 = sld [smem:[#allocation22_spill]] }
 0xa7c   : > { %s5205_s29 = sld [smem:[#allocation35_spill]]  ;;  %s5206_s26 = sld [smem:[#allocation24_spill]] }
 0xa7d   : > { %s5207_s10 = sld [smem:[#allocation36_spill]]  ;;  %s5208_s5 = sld [smem:[#allocation32_spill]] }
 0xa7e   : > { %s5209_s20 = sld [smem:[#allocation34_spill]]  ;;  %s5210_s30 = smov %s4124_s9 }
 0xa7f   : > { %s5212_s11 = smov %s4140_s13  ;;  %s5213_s12 = smov %s4144_s14 }
 0xa80   :  { %32 = sbr.rel (!%p30_p5) target bundleno = 21 (0x15), region = 176 }
 0xa82   : > { %s5211_s9 = smov %s5206_s26 }
 0xa83   : > { %s5214_s13 = smov %s5208_s5 }
 0xa84   : > { %s5215_s14 = smov %s5209_s20 }
 0xa87   :  { %3014 = vsyncpa [#allocation3], 1 }
 0xa88   :  { %3016 = vsyncpa [#allocation3 + $0x1], 1 }
 0xa89   :  { %3017 = vsyncpa [#allocation6], 1 }
 0xa8a   :  { %3019 = vsyncpa [#allocation6 + $0x1], 1 }
 0xa8b   :  { %3020 = vsyncpa [#allocation9], 1 }
 0xa8c   :  { %3022 = vsyncpa [#allocation9 + $0x1], 1 }
 0xa8d   :  { %3023 = vsyncpa [#allocation12], 1 }
 0xa8e   :  { %3025 = vsyncpa [#allocation12 + $0x1], 1 }
 0xa8f   :  { %3026 = vsyncpa [#allocation4], 1 }
 0xa90   :  { %3028 = vsyncpa [#allocation4 + $0x1], 1 }

</bundles_post_ra>
